<compile_context>
chip_gen: v7x
topology: tpu7x:2x2x1
jax: 0.10.0
libtpu: 0.0.40
codegen_flags: <defaults>
</compile_context>

<pallas_src>
import functools

import numpy as np
import jax
import jax.numpy as jnp
from jax import lax
from jax.experimental import pallas as pl
from jax.experimental.pallas import tpu as pltpu


# ----------------------------------------------------------------------------
# Linear-operator constructions (match PyTorch AdaptiveAvgPool2d / bilinear)
# ----------------------------------------------------------------------------
def _adaptive_pool_matrix(H, W, s):
    """(s*s, H*W) matrix implementing nn.AdaptiveAvgPool2d(s)."""
    P = np.zeros((s * s, H * W), np.float32)
    for i in range(s):
        h0, h1 = (i * H) // s, -(-((i + 1) * H) // s)
        for j in range(s):
            w0, w1 = (j * W) // s, -(-((j + 1) * W) // s)
            area = float((h1 - h0) * (w1 - w0))
            for h in range(h0, h1):
                for w in range(w0, w1):
                    P[i * s + j, h * W + w] = 1.0 / area
    return P


def _bilinear_1d(out_size, in_size):
    """(out_size, in_size) bilinear resize matrix, align_corners=False."""
    M = np.zeros((out_size, in_size), np.float32)
    scale = in_size / out_size
    for d in range(out_size):
        src = max((d + 0.5) * scale - 0.5, 0.0)
        i0 = min(int(np.floor(src)), in_size - 1)
        i1 = i0 + 1 if i0 < in_size - 1 else i0
        l1 = src - i0
        M[d, i0] += 1.0 - l1
        M[d, i1] += l1
    return M


def _bilinear_matrix(H, W, s):
    """(H*W, s*s): bilinear upsample from s x s to H x W, align_corners=False."""
    Mh = _bilinear_1d(H, s)
    Mw = _bilinear_1d(W, s)
    return np.einsum("hi,wj->hwij", Mh, Mw).reshape(H * W, s * s).astype(np.float32)


# ----------------------------------------------------------------------------
# The fused Pallas kernel
# ----------------------------------------------------------------------------
def _ppm_fused_kernel(xp_ref, p_ref, wall_ref, ball_ref, mask_ref, m_ref,
                      w3x_ref, w3u_ref, b3_ref, w1_ref, b1_ref,
                      o_ref, y_sc, *, W, Th, alpha):
    # xp_ref : (1, (H+2)*W+2, Cin) bf16   zero-padded token map (1 halo row of H
    #                                      top+bottom plus 1 guard token each end)
    # p_ref  : (SS_pad, (H+2)*W+2) bf16   stacked adaptive-pool matrices (all branches)
    # wall   : (Cin, NB*Ch) bf16          per-branch 1x1 weights, BN scale folded in
    # ball   : (1, NB*Ch) f32             folded BN biases
    # mask   : (SS_pad, NB*Ch) f32        block-diagonal branch mask
    # m_ref  : ((H+2)*W+2, SS_pad) bf16   stacked bilinear upsample matrices (row-padded)
    # w3x/w3u: (9, Cin, Ch)/(9, NB*Ch, Ch) bf16  3x3 conv taps split by channel group
    # b3     : (1, Ch) f32                folded BN bias of the 3x3 conv
    # w1/b1  : (Ch, CLS_PAD) bf16 / (1, CLS_PAD) f32 (padded classes have bias -1e30)
    # o_ref  : (1, Th*W, CLS_PAD) f32     per-tile softmax probabilities
    # y_sc   : VMEM (SS_pad, NB*Ch) bf16  pooled->1x1->BN->LeakyReLU, block-diag masked
    ThW = Th * W
    HALO = ThW + 2 * W + 2
    t = pl.program_id(1)

    # ---- once per batch element: pooling + 1x1 conv + BN + LeakyReLU --------
    @pl.when(t == 0)
    def _():
        x = xp_ref[0]                                                     # (HPW2, Cin)
        pooled = jnp.dot(p_ref[...], x, preferred_element_type=jnp.float32)
        y = jnp.dot(pooled.astype(jnp.bfloat16), wall_ref[...],
                    preferred_element_type=jnp.float32)
        y = y + ball_ref[...]
        y = jnp.where(y >= 0.0, y, alpha * y)                             # LeakyReLU
        y_sc[...] = (y * mask_ref[...]).astype(y_sc.dtype)                # block-diag

    # ---- per spatial tile: upsample + 9-tap 3x3 conv + head -----------------
    start = pl.multiple_of(t * ThW, ThW)
    # halo'd x tokens and on-the-fly reconstructed branch features (upsample)
    hx = xp_ref[0, pl.ds(start, HALO), :].astype(jnp.float32)             # (HALO, Cin)
    hu = jnp.dot(m_ref[pl.ds(start, HALO), :], y_sc[...],
                 preferred_element_type=jnp.float32)                      # (HALO, NB*Ch)

    ch = b3_ref.shape[1]
    wcol = lax.broadcasted_iota(jnp.int32, (ThW, 1), 0) % W
    acc = jnp.zeros((ThW, ch), jnp.float32)
    for k in range(9):                                                    # 3x3 taps
        dy, dx = k // 3 - 1, k % 3 - 1
        o = (dy + 1) * W + dx + 1
        xs = lax.slice(hx, (o, 0), (o + ThW, hx.shape[1])).astype(jnp.bfloat16)
        us = lax.slice(hu, (o, 0), (o + ThW, hu.shape[1])).astype(jnp.bfloat16)
        c = (jnp.dot(xs, w3x_ref[k], preferred_element_type=jnp.float32) +
             jnp.dot(us, w3u_ref[k], preferred_element_type=jnp.float32))
        if dx == -1:                                                      # column edge masks
            c = jnp.where(wcol > 0, c, 0.0)
        elif dx == 1:
            c = jnp.where(wcol < W - 1, c, 0.0)
        acc = acc + c

    acc = acc + b3_ref[...]                                               # folded BN bias
    acc = jnp.where(acc >= 0.0, acc, alpha * acc)                         # LeakyReLU
    # TODO(synk): Dropout2d(0.1) is identity in eval mode; training dropout omitted.
    logits = jnp.dot(acc.astype(jnp.bfloat16), w1_ref[...],
                     preferred_element_type=jnp.float32) + b1_ref[...]
    mmax = jnp.max(logits, axis=-1, keepdims=True)
    e = jnp.exp(logits - mmax)
    denom = jnp.sum(e, axis=-1, keepdims=True)
    o_ref[0] = (e * pl.reciprocal(denom, approx=True)).astype(o_ref.dtype)


def _ppm_pallas(xp, params, *, H, W, th, alpha):
    N, HPW2, Cin = xp.shape
    assert H % th == 0, "tile height must divide H"
    HW = H * W
    ThW = th * W
    T = H // th
    SS_pad, NBCh = params["maskbd"].shape
    Ch = params["b3"].shape[1]
    CLS_PAD = params["b1"].shape[1]

    kernel = functools.partial(_ppm_fused_kernel, W=W, Th=th, alpha=alpha)
    return pl.pallas_call(
        kernel,
        out_shape=jax.ShapeDtypeStruct((N, HW, CLS_PAD), jnp.float32),
        grid=(N, T),
        in_specs=[
            pl.BlockSpec((1, HPW2, Cin), lambda n, t: (n, 0, 0)),   # x (resident per n)
            pl.BlockSpec((SS_pad, HPW2), lambda n, t: (0, 0)),      # pooling matrix
            pl.BlockSpec((Cin, NBCh),    lambda n, t: (0, 0)),      # 1x1 weights (BN folded)
            pl.BlockSpec((1, NBCh),      lambda n, t: (0, 0)),      # folded BN bias
            pl.BlockSpec((SS_pad, NBCh), lambda n, t: (0, 0)),      # branch block mask
            pl.BlockSpec((HPW2, SS_pad), lambda n, t: (0, 0)),      # bilinear matrix
            pl.BlockSpec((9, Cin, Ch),   lambda n, t: (0, 0, 0)),   # 3x3 taps (x group)
            pl.BlockSpec((9, NBCh, Ch),  lambda n, t: (0, 0, 0)),   # 3x3 taps (branch group)
            pl.BlockSpec((1, Ch),        lambda n, t: (0, 0)),      # folded BN bias (3x3)
            pl.BlockSpec((Ch, CLS_PAD),  lambda n, t: (0, 0)),      # classifier weight
            pl.BlockSpec((1, CLS_PAD),   lambda n, t: (0, 0)),      # classifier bias
        ],
        out_specs=pl.BlockSpec((1, ThW, CLS_PAD), lambda n, t: (n, t, 0)),
        scratch_shapes=[pltpu.VMEM((SS_pad, NBCh), jnp.bfloat16)],
        compiler_params=pltpu.CompilerParams(
            dimension_semantics=("parallel", "arbitrary"),
            vmem_limit_bytes=48 * 1024 * 1024),
    )(xp, params["Ppad2"], params["Wall"], params["ball"], params["maskbd"],
      params["Mpad2"], params["w3x"], params["w3u"], params["b3"],
      params["w1"], params["b1"])


# ----------------------------------------------------------------------------
# Parameters (synthetic, deterministic) with BN folded into the conv weights
# ----------------------------------------------------------------------------
def init_params(key, *, fc_dim, hidden, n_class, pool_scales, H, W, eps=1e-5):
    HW = H * W
    HPW2 = (H + 2) * W + 2
    NB = len(pool_scales)
    NBCh = NB * hidden
    sss = [s * s for s in pool_scales]
    SS = sum(sss)
    SS_pad = -(-SS // 8) * 8
    CLS_PAD = -(-n_class // 128) * 128

    keys = jax.random.split(key, 32)
    it = iter(keys)
    nk = lambda: next(it)

    def bn_fold(c):
        gamma = 1.0 + 0.1 * jax.random.normal(nk(), (c,), jnp.float32)
        beta = 0.1 * jax.random.normal(nk(), (c,), jnp.float32)
        mean = 0.1 * jax.random.normal(nk(), (c,), jnp.float32)
        var = jax.random.uniform(nk(), (c,), jnp.float32, 0.5, 1.5)
        scale = gamma / jnp.sqrt(var + eps)
        bias = beta - mean * scale
        return scale, bias

    # Stacked pooling / upsample operators, zero-padded to the padded token map.
    P_all = np.zeros((SS, HW), np.float32)
    M_all = np.zeros((HW, SS), np.float32)
    maskbd = np.zeros((SS_pad, NBCh), np.float32)
    off = 0
    for b, s in enumerate(pool_scales):
        ss = s * s
        P_all[off:off + ss] = _adaptive_pool_matrix(H, W, s)
        M_all[:, off:off + ss] = _bilinear_matrix(H, W, s)
        maskbd[off:off + ss, b * hidden:(b + 1) * hidden] = 1.0
        off += ss
    Ppad2 = np.zeros((SS_pad, HPW2), np.float32)
    Ppad2[:SS, W + 1:W + 1 + HW] = P_all
    Mpad2 = np.zeros((HPW2, SS_pad), np.float32)
    Mpad2[W + 1:W + 1 + HW, :SS] = M_all

    # Per-branch 1x1 conv weights with folded BatchNorm scale.
    wall_cols, ball_cols = [], []
    for _ in range(NB):
        wb = 0.05 * jax.random.normal(nk(), (fc_dim, hidden), jnp.float32)
        scale, bias = bn_fold(hidden)
        wall_cols.append(wb * scale[None, :])
        ball_cols.append(bias)
    Wall = jnp.concatenate(wall_cols, axis=1)                 # (fc_dim, NB*hidden)
    ball = jnp.concatenate(ball_cols)[None, :]                # (1, NB*hidden)

    # 3x3 conv weights, split by input channel group (x part / branch part),
    # tap order k = (dy+1)*3 + (dx+1); BN scale folded into output channels.
    w3x = 0.02 * jax.random.normal(nk(), (9, fc_dim, hidden), jnp.float32)
    w3u = 0.02 * jax.random.normal(nk(), (9, NBCh, hidden), jnp.float32)
    scale3, bias3 = bn_fold(hidden)
    w3x = w3x * scale3[None, None, :]
    w3u = w3u * scale3[None, None, :]
    b3 = bias3[None, :]

    # Classifier, lane-dense padded class axis (padded logits get bias -1e30).
    w1r = 0.05 * jax.random.normal(nk(), (hidden, n_class), jnp.float32)
    b1r = 0.05 * jax.random.normal(nk(), (n_class,), jnp.float32)
    w1 = jnp.zeros((hidden, CLS_PAD), jnp.float32).at[:, :n_class].set(w1r)
    b1 = jnp.full((1, CLS_PAD), -1e30, jnp.float32).at[0, :n_class].set(b1r)

    bf = jnp.bfloat16
    return dict(
        Ppad2=jnp.asarray(Ppad2).astype(bf), Mpad2=jnp.asarray(Mpad2).astype(bf),
        maskbd=jnp.asarray(maskbd), Wall=Wall.astype(bf), ball=ball,
        w3x=w3x.astype(bf), w3u=w3u.astype(bf), b3=b3,
        w1=w1.astype(bf), b1=b1, n_class=n_class)


# ----------------------------------------------------------------------------
# Pure-JAX reference (independent 3x3 conv via lax.conv) and full forward
# ----------------------------------------------------------------------------
def _ppm_reference(xp, params, *, H, W, alpha):
    N, HPW2, Cin = xp.shape
    HW = H * W
    f32 = jnp.float32
    leaky = lambda v: jnp.where(v >= 0.0, v, alpha * v)

    xp32 = xp.astype(f32)
    pooled = jnp.einsum("sq,nqc->nsc", params["Ppad2"].astype(f32), xp32)
    pooled = pooled.astype(jnp.bfloat16).astype(f32)
    y = jnp.einsum("nsc,cd->nsd", pooled, params["Wall"].astype(f32)) + params["ball"]
    y = (leaky(y) * params["maskbd"]).astype(jnp.bfloat16).astype(f32)
    u = jnp.einsum("qs,nsd->nqd", params["Mpad2"].astype(f32), y)
    u = u.astype(jnp.bfloat16).astype(f32)

    def center(tok):
        return tok[:, W + 1:W + 1 + HW, :].reshape(N, H, W, tok.shape[-1])

    feat = jnp.concatenate([center(xp32), center(u)], axis=-1)        # (N,H,W,Ctot)
    w3 = jnp.concatenate([params["w3x"], params["w3u"]], axis=1).astype(f32)
    ctot, ch = w3.shape[1], w3.shape[2]
    w3 = w3.reshape(3, 3, ctot, ch)
    z = lax.conv_general_dilated(feat, w3, window_strides=(1, 1), padding="SAME",
                                 dimension_numbers=("NHWC", "HWIO", "NHWC"),
                                 preferred_element_type=f32)
    z = leaky(z + params["b3"][0])
    logits = jnp.einsum("nhwc,cd->nhwd", z.astype(jnp.bfloat16).astype(f32),
                        params["w1"].astype(f32)) + params["b1"][0]
    return jax.nn.softmax(logits, axis=-1)                             # (N,H,W,CLS_PAD)


def ppm_forward(conv_out, params, *, alpha=0.2, th=4, use_pallas=True):
    """conv_out: list whose first element is conv5 in NCHW.  Returns NCHW probs."""
    conv5 = conv_out[0]
    N, Cin, H, W = conv5.shape
    n_class = params["n_class"]

    x = jnp.transpose(conv5, (0, 2, 3, 1)).astype(jnp.bfloat16)        # NHWC bf16
    xp = jnp.pad(x, ((0, 0), (1, 1), (0, 0), (0, 0)))                  # pad H by 1 row
    xp = xp.reshape(N, (H + 2) * W, Cin)
    xp = jnp.pad(xp, ((0, 0), (1, 1), (0, 0)))                         # 1 guard token/end

    if use_pallas:
        probs = _ppm_pallas(xp, params, H=H, W=W, th=th, alpha=alpha)
        probs = probs.reshape(N, H, W, -1)
    else:
        probs = _ppm_reference(xp, params, H=H, W=W, alpha=alpha)

    probs = probs[..., :n_class]
    return jnp.transpose(probs, (0, 3, 1, 2))


if __name__ == "__main__":
    # Small analogs of (n_class=150, fc_dim=2048, hidden=512): keep pool_scales,
    # H=W=12 so every pyramid scale (1,2,3,6) is exercised.
    N, fc_dim, H, W = 2, 64, 12, 12
    hidden, n_class = 32, 16
    pool_scales = (1, 2, 3, 6)

    key = jax.random.PRNGKey(0)
    kx, kp = jax.random.split(key)
    conv5 = jax.random.normal(kx, (N, fc_dim, H, W), jnp.float32)
    params = init_params(kp, fc_dim=fc_dim, hidden=hidden, n_class=n_class,
                         pool_scales=pool_scales, H=H, W=W)

    out = ppm_forward([conv5], params, alpha=0.2, th=4, use_pallas=True)
    out = jax.block_until_ready(out)

    assert out.shape == (N, n_class, H, W), out.shape
    assert bool(jnp.all(jnp.isfinite(out)))
    # eval-mode softmax over the class channel must sum to ~1
    np.testing.assert_allclose(np.asarray(jnp.sum(out, axis=1)), 1.0,
                               rtol=5e-3, atol=5e-3)
    # compare against the independent pure-JAX reference path
    ref = jax.block_until_ready(ppm_forward([conv5], params, alpha=0.2,
                                            use_pallas=False))
    np.testing.assert_allclose(np.asarray(out), np.asarray(ref),
                               rtol=5e-2, atol=1e-2)

    print("KERNEL_OK")
</pallas_src>

<mosaic_0001>
module attributes {stable_mosaic.version = 11 : i64} {
  func.func @_ppm_fused_kernel(%arg0: i32, %arg1: i32, %arg2: memref<1x170x64xbf16, #tpu.memory_space<vmem>>, %arg3: memref<56x170xbf16, #tpu.memory_space<vmem>>, %arg4: memref<64x128xbf16, #tpu.memory_space<vmem>>, %arg5: memref<1x128xf32, #tpu.memory_space<vmem>>, %arg6: memref<56x128xf32, #tpu.memory_space<vmem>>, %arg7: memref<170x56xbf16, #tpu.memory_space<vmem>>, %arg8: memref<9x64x32xbf16, #tpu.memory_space<vmem>>, %arg9: memref<9x128x32xbf16, #tpu.memory_space<vmem>>, %arg10: memref<1x32xf32, #tpu.memory_space<vmem>>, %arg11: memref<32x128xbf16, #tpu.memory_space<vmem>>, %arg12: memref<1x128xf32, #tpu.memory_space<vmem>>, %arg13: memref<1x48x128xf32, #tpu.memory_space<vmem>>, %arg14: memref<56x128xbf16, #tpu.memory_space<vmem>>) attributes {dimension_semantics = [#tpu.dimension_semantics<parallel>, #tpu.dimension_semantics<arbitrary>], iteration_bounds = array<i64: 2, 3>, scalar_prefetch = 0 : i64, scratch_operands = 1 : i64, tpu.core_type = #tpu.core_type<tc>, window_params = [{transform_indices = @transform_0, window_bounds = array<i64: 1, 170, 64>}, {pipeline_mode = #tpu.pipeline_mode<synchronous>, transform_indices = @transform_1, window_bounds = array<i64: 56, 170>}, {pipeline_mode = #tpu.pipeline_mode<synchronous>, transform_indices = @transform_2, window_bounds = array<i64: 64, 128>}, {pipeline_mode = #tpu.pipeline_mode<synchronous>, transform_indices = @transform_3, window_bounds = array<i64: 1, 128>}, {pipeline_mode = #tpu.pipeline_mode<synchronous>, transform_indices = @transform_4, window_bounds = array<i64: 56, 128>}, {pipeline_mode = #tpu.pipeline_mode<synchronous>, transform_indices = @transform_5, window_bounds = array<i64: 170, 56>}, {pipeline_mode = #tpu.pipeline_mode<synchronous>, transform_indices = @transform_6, window_bounds = array<i64: 9, 64, 32>}, {pipeline_mode = #tpu.pipeline_mode<synchronous>, transform_indices = @transform_7, window_bounds = array<i64: 9, 128, 32>}, {pipeline_mode = #tpu.pipeline_mode<synchronous>, transform_indices = @transform_8, window_bounds = array<i64: 1, 32>}, {pipeline_mode = #tpu.pipeline_mode<synchronous>, transform_indices = @transform_9, window_bounds = array<i64: 32, 128>}, {pipeline_mode = #tpu.pipeline_mode<synchronous>, transform_indices = @transform_10, window_bounds = array<i64: 1, 128>}, {transform_indices = @transform_11, window_bounds = array<i64: 1, 48, 128>}]} {
    %c0_i32 = arith.constant 0 : i32
    %0 = arith.cmpi eq, %arg1, %c0_i32 : i32
    %1 = arith.extui %0 : i1 to i32
    %c0_i32_0 = arith.constant 0 : i32
    %2 = arith.cmpi ne, %1, %c0_i32_0 : i32
    scf.if %2 {
      %c0_99 = arith.constant 0 : index
      %c0_100 = arith.constant 0 : index
      %c0_101 = arith.constant 0 : index
      %202 = vector.load %arg2[%c0_99, %c0_100, %c0_101] : memref<1x170x64xbf16, #tpu.memory_space<vmem>>, vector<1x170x64xbf16>
      %203 = vector.shape_cast %202 : vector<1x170x64xbf16> to vector<170x64xbf16>
      %c0_102 = arith.constant 0 : index
      %c0_103 = arith.constant 0 : index
      %204 = vector.load %arg3[%c0_102, %c0_103] : memref<56x170xbf16, #tpu.memory_space<vmem>>, vector<56x170xbf16>
      %cst_104 = arith.constant dense<0.000000e+00> : vector<56x64xf32>
      %205 = tpu.matmul %204, %203, %cst_104 {dimension_numbers = #tpu.dot_dimension_numbers<[1], [0], [0], [1], [0, 0, 1, 1], [], []>} : vector<56x170xbf16>, vector<170x64xbf16>, vector<56x64xf32> -> vector<56x64xf32>
      %206 = arith.truncf %205 : vector<56x64xf32> to vector<56x64xbf16>
      %c0_105 = arith.constant 0 : index
      %c0_106 = arith.constant 0 : index
      %207 = vector.load %arg4[%c0_105, %c0_106] : memref<64x128xbf16, #tpu.memory_space<vmem>>, vector<64x128xbf16>
      %cst_107 = arith.constant dense<0.000000e+00> : vector<56x128xf32>
      %208 = tpu.matmul %206, %207, %cst_107 {dimension_numbers = #tpu.dot_dimension_numbers<[1], [0], [0], [1], [0, 0, 1, 1], [], []>} : vector<56x64xbf16>, vector<64x128xbf16>, vector<56x128xf32> -> vector<56x128xf32>
      %c0_108 = arith.constant 0 : index
      %c0_109 = arith.constant 0 : index
      %209 = vector.load %arg5[%c0_108, %c0_109] : memref<1x128xf32, #tpu.memory_space<vmem>>, vector<1x128xf32>
      %210 = vector.broadcast %209 : vector<1x128xf32> to vector<56x128xf32>
      %211 = arith.addf %208, %210 : vector<56x128xf32>
      %cst_110 = arith.constant 0.000000e+00 : f32
      %212 = vector.broadcast %cst_110 : f32 to vector<56x128xf32>
      %213 = arith.cmpf oge, %211, %212 : vector<56x128xf32>
      %cst_111 = arith.constant 2.000000e-01 : f32
      %214 = vector.broadcast %cst_111 : f32 to vector<56x128xf32>
      %215 = arith.mulf %214, %211 : vector<56x128xf32>
      %216 = arith.select %213, %211, %215 : vector<56x128xi1>, vector<56x128xf32>
      %c0_112 = arith.constant 0 : index
      %c0_113 = arith.constant 0 : index
      %217 = vector.load %arg6[%c0_112, %c0_113] : memref<56x128xf32, #tpu.memory_space<vmem>>, vector<56x128xf32>
      %218 = arith.mulf %216, %217 : vector<56x128xf32>
      %219 = arith.truncf %218 : vector<56x128xf32> to vector<56x128xbf16>
      %c0_114 = arith.constant 0 : index
      %c0_115 = arith.constant 0 : index
      %220 = vector.load %arg14[%c0_114, %c0_115] : memref<56x128xbf16, #tpu.memory_space<vmem>>, vector<56x128xbf16>
      tpu.vector_store %arg14[%c0_114, %c0_115], %219 {strides = array<i32>} : memref<56x128xbf16, #tpu.memory_space<vmem>>, vector<56x128xbf16>,
    } else {
    }
    %c48_i32 = arith.constant 48 : i32
    %3 = arith.muli %arg1, %c48_i32 : i32
    %4 = tpu.assume_multiple %3, 48 : i32
    %c0 = arith.constant 0 : index
    %5 = arith.index_cast %4 : i32 to index
    %c0_1 = arith.constant 0 : index
    %6 = vector.load %arg2[%c0, %5, %c0_1] : memref<1x170x64xbf16, #tpu.memory_space<vmem>>, vector<1x74x64xbf16>
    %7 = vector.shape_cast %6 : vector<1x74x64xbf16> to vector<74x64xbf16>
    %8 = arith.extf %7 : vector<74x64xbf16> to vector<74x64xf32>
    %9 = arith.index_cast %4 : i32 to index
    %c0_2 = arith.constant 0 : index
    %10 = vector.load %arg7[%9, %c0_2] : memref<170x56xbf16, #tpu.memory_space<vmem>>, vector<74x56xbf16>
    %c0_3 = arith.constant 0 : index
    %c0_4 = arith.constant 0 : index
    %11 = vector.load %arg14[%c0_3, %c0_4] : memref<56x128xbf16, #tpu.memory_space<vmem>>, vector<56x128xbf16>
    %cst = arith.constant dense<0.000000e+00> : vector<74x128xf32>
    %12 = tpu.matmul %10, %11, %cst {dimension_numbers = #tpu.dot_dimension_numbers<[1], [0], [0], [1], [0, 0, 1, 1], [], []>} : vector<74x56xbf16>, vector<56x128xbf16>, vector<74x128xf32> -> vector<74x128xf32>
    %13 = tpu.iota {dimensions = array<i32: 0>} : vector<48x1xi32>
    %c12_i32 = arith.constant 12 : i32
    %c0_i32_5 = arith.constant 0 : i32
    %14 = arith.cmpi eq, %c12_i32, %c0_i32_5 : i32
    %c1_i32 = arith.constant 1 : i32
    %15 = arith.select %14, %c1_i32, %c12_i32 : i32
    %16 = vector.broadcast %15 : i32 to vector<48x1xi32>
    %17 = arith.remsi %13, %16 : vector<48x1xi32>
    %c0_i32_6 = arith.constant 0 : i32
    %18 = vector.broadcast %c0_i32_6 : i32 to vector<48x1xi32>
    %19 = arith.cmpi ne, %17, %18 : vector<48x1xi32>
    %c0_i32_7 = arith.constant 0 : i32
    %20 = vector.broadcast %c0_i32_7 : i32 to vector<48x1xi32>
    %21 = arith.cmpi slt, %17, %20 : vector<48x1xi32>
    %c0_i32_8 = arith.constant 0 : i32
    %22 = arith.cmpi slt, %15, %c0_i32_8 : i32
    %23 = vector.broadcast %22 : i1 to vector<48x1xi1>
    %24 = vector.broadcast %23 : vector<48x1xi1> to vector<48x1xi1>
    %25 = arith.xori %21, %24 : vector<48x1xi1>
    %26 = arith.andi %25, %19 : vector<48x1xi1>
    %27 = vector.broadcast %15 : i32 to vector<48x1xi32>
    %28 = arith.addi %17, %27 : vector<48x1xi32>
    %29 = arith.select %26, %28, %17 : vector<48x1xi1>, vector<48x1xi32>
    %cst_9 = arith.constant 0.000000e+00 : f32
    %30 = vector.broadcast %cst_9 : f32 to vector<48x32xf32>
    %31 = vector.extract_strided_slice %8 {offsets = [0, 0], sizes = [48, 64], strides = [1, 1]} : vector<74x64xf32> to vector<48x64xf32>
    %32 = arith.truncf %31 : vector<48x64xf32> to vector<48x64xbf16>
    %33 = vector.extract_strided_slice %12 {offsets = [0, 0], sizes = [48, 128], strides = [1, 1]} : vector<74x128xf32> to vector<48x128xf32>
    %34 = arith.truncf %33 : vector<48x128xf32> to vector<48x128xbf16>
    %c0_10 = arith.constant 0 : index
    %c0_11 = arith.constant 0 : index
    %c0_12 = arith.constant 0 : index
    %35 = vector.load %arg8[%c0_10, %c0_11, %c0_12] : memref<9x64x32xbf16, #tpu.memory_space<vmem>>, vector<1x64x32xbf16>
    %36 = vector.shape_cast %35 : vector<1x64x32xbf16> to vector<64x32xbf16>
    %cst_13 = arith.constant dense<0.000000e+00> : vector<48x32xf32>
    %37 = tpu.matmul %32, %36, %cst_13 {dimension_numbers = #tpu.dot_dimension_numbers<[1], [0], [0], [1], [0, 0, 1, 1], [], []>} : vector<48x64xbf16>, vector<64x32xbf16>, vector<48x32xf32> -> vector<48x32xf32>
    %c0_14 = arith.constant 0 : index
    %c0_15 = arith.constant 0 : index
    %c0_16 = arith.constant 0 : index
    %38 = vector.load %arg9[%c0_14, %c0_15, %c0_16] : memref<9x128x32xbf16, #tpu.memory_space<vmem>>, vector<1x128x32xbf16>
    %39 = vector.shape_cast %38 : vector<1x128x32xbf16> to vector<128x32xbf16>
    %cst_17 = arith.constant dense<0.000000e+00> : vector<48x32xf32>
    %40 = tpu.matmul %34, %39, %cst_17 {dimension_numbers = #tpu.dot_dimension_numbers<[1], [0], [0], [1], [0, 0, 1, 1], [], []>} : vector<48x128xbf16>, vector<128x32xbf16>, vector<48x32xf32> -> vector<48x32xf32>
    %41 = arith.addf %37, %40 : vector<48x32xf32>
    %c0_i32_18 = arith.constant 0 : i32
    %42 = vector.broadcast %c0_i32_18 : i32 to vector<48x1xi32>
    %43 = arith.cmpi sgt, %29, %42 : vector<48x1xi32>
    %cst_19 = arith.constant 0.000000e+00 : f32
    %44 = vector.shape_cast %43 : vector<48x1xi1> to vector<48x1xi1>
    %45 = vector.broadcast %44 : vector<48x1xi1> to vector<48x32xi1>
    %46 = vector.broadcast %cst_19 : f32 to vector<48x32xf32>
    %47 = arith.select %45, %41, %46 : vector<48x32xi1>, vector<48x32xf32>
    %48 = arith.addf %30, %47 : vector<48x32xf32>
    %49 = vector.extract_strided_slice %8 {offsets = [1, 0], sizes = [48, 64], strides = [1, 1]} : vector<74x64xf32> to vector<48x64xf32>
    %50 = arith.truncf %49 : vector<48x64xf32> to vector<48x64xbf16>
    %51 = vector.extract_strided_slice %12 {offsets = [1, 0], sizes = [48, 128], strides = [1, 1]} : vector<74x128xf32> to vector<48x128xf32>
    %52 = arith.truncf %51 : vector<48x128xf32> to vector<48x128xbf16>
    %c1 = arith.constant 1 : index
    %c0_20 = arith.constant 0 : index
    %c0_21 = arith.constant 0 : index
    %53 = vector.load %arg8[%c1, %c0_20, %c0_21] : memref<9x64x32xbf16, #tpu.memory_space<vmem>>, vector<1x64x32xbf16>
    %54 = vector.shape_cast %53 : vector<1x64x32xbf16> to vector<64x32xbf16>
    %cst_22 = arith.constant dense<0.000000e+00> : vector<48x32xf32>
    %55 = tpu.matmul %50, %54, %cst_22 {dimension_numbers = #tpu.dot_dimension_numbers<[1], [0], [0], [1], [0, 0, 1, 1], [], []>} : vector<48x64xbf16>, vector<64x32xbf16>, vector<48x32xf32> -> vector<48x32xf32>
    %c1_23 = arith.constant 1 : index
    %c0_24 = arith.constant 0 : index
    %c0_25 = arith.constant 0 : index
    %56 = vector.load %arg9[%c1_23, %c0_24, %c0_25] : memref<9x128x32xbf16, #tpu.memory_space<vmem>>, vector<1x128x32xbf16>
    %57 = vector.shape_cast %56 : vector<1x128x32xbf16> to vector<128x32xbf16>
    %cst_26 = arith.constant dense<0.000000e+00> : vector<48x32xf32>
    %58 = tpu.matmul %52, %57, %cst_26 {dimension_numbers = #tpu.dot_dimension_numbers<[1], [0], [0], [1], [0, 0, 1, 1], [], []>} : vector<48x128xbf16>, vector<128x32xbf16>, vector<48x32xf32> -> vector<48x32xf32>
    %59 = arith.addf %55, %58 : vector<48x32xf32>
    %60 = arith.addf %48, %59 : vector<48x32xf32>
    %61 = vector.extract_strided_slice %8 {offsets = [2, 0], sizes = [48, 64], strides = [1, 1]} : vector<74x64xf32> to vector<48x64xf32>
    %62 = arith.truncf %61 : vector<48x64xf32> to vector<48x64xbf16>
    %63 = vector.extract_strided_slice %12 {offsets = [2, 0], sizes = [48, 128], strides = [1, 1]} : vector<74x128xf32> to vector<48x128xf32>
    %64 = arith.truncf %63 : vector<48x128xf32> to vector<48x128xbf16>
    %c2 = arith.constant 2 : index
    %c0_27 = arith.constant 0 : index
    %c0_28 = arith.constant 0 : index
    %65 = vector.load %arg8[%c2, %c0_27, %c0_28] : memref<9x64x32xbf16, #tpu.memory_space<vmem>>, vector<1x64x32xbf16>
    %66 = vector.shape_cast %65 : vector<1x64x32xbf16> to vector<64x32xbf16>
    %cst_29 = arith.constant dense<0.000000e+00> : vector<48x32xf32>
    %67 = tpu.matmul %62, %66, %cst_29 {dimension_numbers = #tpu.dot_dimension_numbers<[1], [0], [0], [1], [0, 0, 1, 1], [], []>} : vector<48x64xbf16>, vector<64x32xbf16>, vector<48x32xf32> -> vector<48x32xf32>
    %c2_30 = arith.constant 2 : index
    %c0_31 = arith.constant 0 : index
    %c0_32 = arith.constant 0 : index
    %68 = vector.load %arg9[%c2_30, %c0_31, %c0_32] : memref<9x128x32xbf16, #tpu.memory_space<vmem>>, vector<1x128x32xbf16>
    %69 = vector.shape_cast %68 : vector<1x128x32xbf16> to vector<128x32xbf16>
    %cst_33 = arith.constant dense<0.000000e+00> : vector<48x32xf32>
    %70 = tpu.matmul %64, %69, %cst_33 {dimension_numbers = #tpu.dot_dimension_numbers<[1], [0], [0], [1], [0, 0, 1, 1], [], []>} : vector<48x128xbf16>, vector<128x32xbf16>, vector<48x32xf32> -> vector<48x32xf32>
    %71 = arith.addf %67, %70 : vector<48x32xf32>
    %c11_i32 = arith.constant 11 : i32
    %72 = vector.broadcast %c11_i32 : i32 to vector<48x1xi32>
    %73 = arith.cmpi slt, %29, %72 : vector<48x1xi32>
    %cst_34 = arith.constant 0.000000e+00 : f32
    %74 = vector.shape_cast %73 : vector<48x1xi1> to vector<48x1xi1>
    %75 = vector.broadcast %74 : vector<48x1xi1> to vector<48x32xi1>
    %76 = vector.broadcast %cst_34 : f32 to vector<48x32xf32>
    %77 = arith.select %75, %71, %76 : vector<48x32xi1>, vector<48x32xf32>
    %78 = arith.addf %60, %77 : vector<48x32xf32>
    %79 = vector.extract_strided_slice %8 {offsets = [12, 0], sizes = [48, 64], strides = [1, 1]} : vector<74x64xf32> to vector<48x64xf32>
    %80 = arith.truncf %79 : vector<48x64xf32> to vector<48x64xbf16>
    %81 = vector.extract_strided_slice %12 {offsets = [12, 0], sizes = [48, 128], strides = [1, 1]} : vector<74x128xf32> to vector<48x128xf32>
    %82 = arith.truncf %81 : vector<48x128xf32> to vector<48x128xbf16>
    %c3 = arith.constant 3 : index
    %c0_35 = arith.constant 0 : index
    %c0_36 = arith.constant 0 : index
    %83 = vector.load %arg8[%c3, %c0_35, %c0_36] : memref<9x64x32xbf16, #tpu.memory_space<vmem>>, vector<1x64x32xbf16>
    %84 = vector.shape_cast %83 : vector<1x64x32xbf16> to vector<64x32xbf16>
    %cst_37 = arith.constant dense<0.000000e+00> : vector<48x32xf32>
    %85 = tpu.matmul %80, %84, %cst_37 {dimension_numbers = #tpu.dot_dimension_numbers<[1], [0], [0], [1], [0, 0, 1, 1], [], []>} : vector<48x64xbf16>, vector<64x32xbf16>, vector<48x32xf32> -> vector<48x32xf32>
    %c3_38 = arith.constant 3 : index
    %c0_39 = arith.constant 0 : index
    %c0_40 = arith.constant 0 : index
    %86 = vector.load %arg9[%c3_38, %c0_39, %c0_40] : memref<9x128x32xbf16, #tpu.memory_space<vmem>>, vector<1x128x32xbf16>
    %87 = vector.shape_cast %86 : vector<1x128x32xbf16> to vector<128x32xbf16>
    %cst_41 = arith.constant dense<0.000000e+00> : vector<48x32xf32>
    %88 = tpu.matmul %82, %87, %cst_41 {dimension_numbers = #tpu.dot_dimension_numbers<[1], [0], [0], [1], [0, 0, 1, 1], [], []>} : vector<48x128xbf16>, vector<128x32xbf16>, vector<48x32xf32> -> vector<48x32xf32>
    %89 = arith.addf %85, %88 : vector<48x32xf32>
    %c0_i32_42 = arith.constant 0 : i32
    %90 = vector.broadcast %c0_i32_42 : i32 to vector<48x1xi32>
    %91 = arith.cmpi sgt, %29, %90 : vector<48x1xi32>
    %cst_43 = arith.constant 0.000000e+00 : f32
    %92 = vector.shape_cast %91 : vector<48x1xi1> to vector<48x1xi1>
    %93 = vector.broadcast %92 : vector<48x1xi1> to vector<48x32xi1>
    %94 = vector.broadcast %cst_43 : f32 to vector<48x32xf32>
    %95 = arith.select %93, %89, %94 : vector<48x32xi1>, vector<48x32xf32>
    %96 = arith.addf %78, %95 : vector<48x32xf32>
    %97 = vector.extract_strided_slice %8 {offsets = [13, 0], sizes = [48, 64], strides = [1, 1]} : vector<74x64xf32> to vector<48x64xf32>
    %98 = arith.truncf %97 : vector<48x64xf32> to vector<48x64xbf16>
    %99 = vector.extract_strided_slice %12 {offsets = [13, 0], sizes = [48, 128], strides = [1, 1]} : vector<74x128xf32> to vector<48x128xf32>
    %100 = arith.truncf %99 : vector<48x128xf32> to vector<48x128xbf16>
    %c4 = arith.constant 4 : index
    %c0_44 = arith.constant 0 : index
    %c0_45 = arith.constant 0 : index
    %101 = vector.load %arg8[%c4, %c0_44, %c0_45] : memref<9x64x32xbf16, #tpu.memory_space<vmem>>, vector<1x64x32xbf16>
    %102 = vector.shape_cast %101 : vector<1x64x32xbf16> to vector<64x32xbf16>
    %cst_46 = arith.constant dense<0.000000e+00> : vector<48x32xf32>
    %103 = tpu.matmul %98, %102, %cst_46 {dimension_numbers = #tpu.dot_dimension_numbers<[1], [0], [0], [1], [0, 0, 1, 1], [], []>} : vector<48x64xbf16>, vector<64x32xbf16>, vector<48x32xf32> -> vector<48x32xf32>
    %c4_47 = arith.constant 4 : index
    %c0_48 = arith.constant 0 : index
    %c0_49 = arith.constant 0 : index
    %104 = vector.load %arg9[%c4_47, %c0_48, %c0_49] : memref<9x128x32xbf16, #tpu.memory_space<vmem>>, vector<1x128x32xbf16>
    %105 = vector.shape_cast %104 : vector<1x128x32xbf16> to vector<128x32xbf16>
    %cst_50 = arith.constant dense<0.000000e+00> : vector<48x32xf32>
    %106 = tpu.matmul %100, %105, %cst_50 {dimension_numbers = #tpu.dot_dimension_numbers<[1], [0], [0], [1], [0, 0, 1, 1], [], []>} : vector<48x128xbf16>, vector<128x32xbf16>, vector<48x32xf32> -> vector<48x32xf32>
    %107 = arith.addf %103, %106 : vector<48x32xf32>
    %108 = arith.addf %96, %107 : vector<48x32xf32>
    %109 = vector.extract_strided_slice %8 {offsets = [14, 0], sizes = [48, 64], strides = [1, 1]} : vector<74x64xf32> to vector<48x64xf32>
    %110 = arith.truncf %109 : vector<48x64xf32> to vector<48x64xbf16>
    %111 = vector.extract_strided_slice %12 {offsets = [14, 0], sizes = [48, 128], strides = [1, 1]} : vector<74x128xf32> to vector<48x128xf32>
    %112 = arith.truncf %111 : vector<48x128xf32> to vector<48x128xbf16>
    %c5 = arith.constant 5 : index
    %c0_51 = arith.constant 0 : index
    %c0_52 = arith.constant 0 : index
    %113 = vector.load %arg8[%c5, %c0_51, %c0_52] : memref<9x64x32xbf16, #tpu.memory_space<vmem>>, vector<1x64x32xbf16>
    %114 = vector.shape_cast %113 : vector<1x64x32xbf16> to vector<64x32xbf16>
    %cst_53 = arith.constant dense<0.000000e+00> : vector<48x32xf32>
    %115 = tpu.matmul %110, %114, %cst_53 {dimension_numbers = #tpu.dot_dimension_numbers<[1], [0], [0], [1], [0, 0, 1, 1], [], []>} : vector<48x64xbf16>, vector<64x32xbf16>, vector<48x32xf32> -> vector<48x32xf32>
    %c5_54 = arith.constant 5 : index
    %c0_55 = arith.constant 0 : index
    %c0_56 = arith.constant 0 : index
    %116 = vector.load %arg9[%c5_54, %c0_55, %c0_56] : memref<9x128x32xbf16, #tpu.memory_space<vmem>>, vector<1x128x32xbf16>
    %117 = vector.shape_cast %116 : vector<1x128x32xbf16> to vector<128x32xbf16>
    %cst_57 = arith.constant dense<0.000000e+00> : vector<48x32xf32>
    %118 = tpu.matmul %112, %117, %cst_57 {dimension_numbers = #tpu.dot_dimension_numbers<[1], [0], [0], [1], [0, 0, 1, 1], [], []>} : vector<48x128xbf16>, vector<128x32xbf16>, vector<48x32xf32> -> vector<48x32xf32>
    %119 = arith.addf %115, %118 : vector<48x32xf32>
    %c11_i32_58 = arith.constant 11 : i32
    %120 = vector.broadcast %c11_i32_58 : i32 to vector<48x1xi32>
    %121 = arith.cmpi slt, %29, %120 : vector<48x1xi32>
    %cst_59 = arith.constant 0.000000e+00 : f32
    %122 = vector.shape_cast %121 : vector<48x1xi1> to vector<48x1xi1>
    %123 = vector.broadcast %122 : vector<48x1xi1> to vector<48x32xi1>
    %124 = vector.broadcast %cst_59 : f32 to vector<48x32xf32>
    %125 = arith.select %123, %119, %124 : vector<48x32xi1>, vector<48x32xf32>
    %126 = arith.addf %108, %125 : vector<48x32xf32>
    %127 = vector.extract_strided_slice %8 {offsets = [24, 0], sizes = [48, 64], strides = [1, 1]} : vector<74x64xf32> to vector<48x64xf32>
    %128 = arith.truncf %127 : vector<48x64xf32> to vector<48x64xbf16>
    %129 = vector.extract_strided_slice %12 {offsets = [24, 0], sizes = [48, 128], strides = [1, 1]} : vector<74x128xf32> to vector<48x128xf32>
    %130 = arith.truncf %129 : vector<48x128xf32> to vector<48x128xbf16>
    %c6 = arith.constant 6 : index
    %c0_60 = arith.constant 0 : index
    %c0_61 = arith.constant 0 : index
    %131 = vector.load %arg8[%c6, %c0_60, %c0_61] : memref<9x64x32xbf16, #tpu.memory_space<vmem>>, vector<1x64x32xbf16>
    %132 = vector.shape_cast %131 : vector<1x64x32xbf16> to vector<64x32xbf16>
    %cst_62 = arith.constant dense<0.000000e+00> : vector<48x32xf32>
    %133 = tpu.matmul %128, %132, %cst_62 {dimension_numbers = #tpu.dot_dimension_numbers<[1], [0], [0], [1], [0, 0, 1, 1], [], []>} : vector<48x64xbf16>, vector<64x32xbf16>, vector<48x32xf32> -> vector<48x32xf32>
    %c6_63 = arith.constant 6 : index
    %c0_64 = arith.constant 0 : index
    %c0_65 = arith.constant 0 : index
    %134 = vector.load %arg9[%c6_63, %c0_64, %c0_65] : memref<9x128x32xbf16, #tpu.memory_space<vmem>>, vector<1x128x32xbf16>
    %135 = vector.shape_cast %134 : vector<1x128x32xbf16> to vector<128x32xbf16>
    %cst_66 = arith.constant dense<0.000000e+00> : vector<48x32xf32>
    %136 = tpu.matmul %130, %135, %cst_66 {dimension_numbers = #tpu.dot_dimension_numbers<[1], [0], [0], [1], [0, 0, 1, 1], [], []>} : vector<48x128xbf16>, vector<128x32xbf16>, vector<48x32xf32> -> vector<48x32xf32>
    %137 = arith.addf %133, %136 : vector<48x32xf32>
    %c0_i32_67 = arith.constant 0 : i32
    %138 = vector.broadcast %c0_i32_67 : i32 to vector<48x1xi32>
    %139 = arith.cmpi sgt, %29, %138 : vector<48x1xi32>
    %cst_68 = arith.constant 0.000000e+00 : f32
    %140 = vector.shape_cast %139 : vector<48x1xi1> to vector<48x1xi1>
    %141 = vector.broadcast %140 : vector<48x1xi1> to vector<48x32xi1>
    %142 = vector.broadcast %cst_68 : f32 to vector<48x32xf32>
    %143 = arith.select %141, %137, %142 : vector<48x32xi1>, vector<48x32xf32>
    %144 = arith.addf %126, %143 : vector<48x32xf32>
    %145 = vector.extract_strided_slice %8 {offsets = [25, 0], sizes = [48, 64], strides = [1, 1]} : vector<74x64xf32> to vector<48x64xf32>
    %146 = arith.truncf %145 : vector<48x64xf32> to vector<48x64xbf16>
    %147 = vector.extract_strided_slice %12 {offsets = [25, 0], sizes = [48, 128], strides = [1, 1]} : vector<74x128xf32> to vector<48x128xf32>
    %148 = arith.truncf %147 : vector<48x128xf32> to vector<48x128xbf16>
    %c7 = arith.constant 7 : index
    %c0_69 = arith.constant 0 : index
    %c0_70 = arith.constant 0 : index
    %149 = vector.load %arg8[%c7, %c0_69, %c0_70] : memref<9x64x32xbf16, #tpu.memory_space<vmem>>, vector<1x64x32xbf16>
    %150 = vector.shape_cast %149 : vector<1x64x32xbf16> to vector<64x32xbf16>
    %cst_71 = arith.constant dense<0.000000e+00> : vector<48x32xf32>
    %151 = tpu.matmul %146, %150, %cst_71 {dimension_numbers = #tpu.dot_dimension_numbers<[1], [0], [0], [1], [0, 0, 1, 1], [], []>} : vector<48x64xbf16>, vector<64x32xbf16>, vector<48x32xf32> -> vector<48x32xf32>
    %c7_72 = arith.constant 7 : index
    %c0_73 = arith.constant 0 : index
    %c0_74 = arith.constant 0 : index
    %152 = vector.load %arg9[%c7_72, %c0_73, %c0_74] : memref<9x128x32xbf16, #tpu.memory_space<vmem>>, vector<1x128x32xbf16>
    %153 = vector.shape_cast %152 : vector<1x128x32xbf16> to vector<128x32xbf16>
    %cst_75 = arith.constant dense<0.000000e+00> : vector<48x32xf32>
    %154 = tpu.matmul %148, %153, %cst_75 {dimension_numbers = #tpu.dot_dimension_numbers<[1], [0], [0], [1], [0, 0, 1, 1], [], []>} : vector<48x128xbf16>, vector<128x32xbf16>, vector<48x32xf32> -> vector<48x32xf32>
    %155 = arith.addf %151, %154 : vector<48x32xf32>
    %156 = arith.addf %144, %155 : vector<48x32xf32>
    %157 = vector.extract_strided_slice %8 {offsets = [26, 0], sizes = [48, 64], strides = [1, 1]} : vector<74x64xf32> to vector<48x64xf32>
    %158 = arith.truncf %157 : vector<48x64xf32> to vector<48x64xbf16>
    %159 = vector.extract_strided_slice %12 {offsets = [26, 0], sizes = [48, 128], strides = [1, 1]} : vector<74x128xf32> to vector<48x128xf32>
    %160 = arith.truncf %159 : vector<48x128xf32> to vector<48x128xbf16>
    %c8 = arith.constant 8 : index
    %c0_76 = arith.constant 0 : index
    %c0_77 = arith.constant 0 : index
    %161 = vector.load %arg8[%c8, %c0_76, %c0_77] : memref<9x64x32xbf16, #tpu.memory_space<vmem>>, vector<1x64x32xbf16>
    %162 = vector.shape_cast %161 : vector<1x64x32xbf16> to vector<64x32xbf16>
    %cst_78 = arith.constant dense<0.000000e+00> : vector<48x32xf32>
    %163 = tpu.matmul %158, %162, %cst_78 {dimension_numbers = #tpu.dot_dimension_numbers<[1], [0], [0], [1], [0, 0, 1, 1], [], []>} : vector<48x64xbf16>, vector<64x32xbf16>, vector<48x32xf32> -> vector<48x32xf32>
    %c8_79 = arith.constant 8 : index
    %c0_80 = arith.constant 0 : index
    %c0_81 = arith.constant 0 : index
    %164 = vector.load %arg9[%c8_79, %c0_80, %c0_81] : memref<9x128x32xbf16, #tpu.memory_space<vmem>>, vector<1x128x32xbf16>
    %165 = vector.shape_cast %164 : vector<1x128x32xbf16> to vector<128x32xbf16>
    %cst_82 = arith.constant dense<0.000000e+00> : vector<48x32xf32>
    %166 = tpu.matmul %160, %165, %cst_82 {dimension_numbers = #tpu.dot_dimension_numbers<[1], [0], [0], [1], [0, 0, 1, 1], [], []>} : vector<48x128xbf16>, vector<128x32xbf16>, vector<48x32xf32> -> vector<48x32xf32>
    %167 = arith.addf %163, %166 : vector<48x32xf32>
    %c11_i32_83 = arith.constant 11 : i32
    %168 = vector.broadcast %c11_i32_83 : i32 to vector<48x1xi32>
    %169 = arith.cmpi slt, %29, %168 : vector<48x1xi32>
    %cst_84 = arith.constant 0.000000e+00 : f32
    %170 = vector.shape_cast %169 : vector<48x1xi1> to vector<48x1xi1>
    %171 = vector.broadcast %170 : vector<48x1xi1> to vector<48x32xi1>
    %172 = vector.broadcast %cst_84 : f32 to vector<48x32xf32>
    %173 = arith.select %171, %167, %172 : vector<48x32xi1>, vector<48x32xf32>
    %174 = arith.addf %156, %173 : vector<48x32xf32>
    %c0_85 = arith.constant 0 : index
    %c0_86 = arith.constant 0 : index
    %175 = vector.load %arg10[%c0_85, %c0_86] : memref<1x32xf32, #tpu.memory_space<vmem>>, vector<1x32xf32>
    %176 = vector.broadcast %175 : vector<1x32xf32> to vector<48x32xf32>
    %177 = arith.addf %174, %176 : vector<48x32xf32>
    %cst_87 = arith.constant 0.000000e+00 : f32
    %178 = vector.broadcast %cst_87 : f32 to vector<48x32xf32>
    %179 = arith.cmpf oge, %177, %178 : vector<48x32xf32>
    %cst_88 = arith.constant 2.000000e-01 : f32
    %180 = vector.broadcast %cst_88 : f32 to vector<48x32xf32>
    %181 = arith.mulf %180, %177 : vector<48x32xf32>
    %182 = arith.select %179, %177, %181 : vector<48x32xi1>, vector<48x32xf32>
    %183 = arith.truncf %182 : vector<48x32xf32> to vector<48x32xbf16>
    %c0_89 = arith.constant 0 : index
    %c0_90 = arith.constant 0 : index
    %184 = vector.load %arg11[%c0_89, %c0_90] : memref<32x128xbf16, #tpu.memory_space<vmem>>, vector<32x128xbf16>
    %cst_91 = arith.constant dense<0.000000e+00> : vector<48x128xf32>
    %185 = tpu.matmul %183, %184, %cst_91 {dimension_numbers = #tpu.dot_dimension_numbers<[1], [0], [0], [1], [0, 0, 1, 1], [], []>} : vector<48x32xbf16>, vector<32x128xbf16>, vector<48x128xf32> -> vector<48x128xf32>
    %c0_92 = arith.constant 0 : index
    %c0_93 = arith.constant 0 : index
    %186 = vector.load %arg12[%c0_92, %c0_93] : memref<1x128xf32, #tpu.memory_space<vmem>>, vector<1x128xf32>
    %187 = vector.broadcast %186 : vector<1x128xf32> to vector<48x128xf32>
    %188 = arith.addf %185, %187 : vector<48x128xf32>
    %cst_94 = arith.constant dense<0xFF800000> : vector<48xf32>
    %189 = vector.multi_reduction <maximumf>, %188, %cst_94 [1] : vector<48x128xf32> to vector<48xf32>
    %190 = vector.shape_cast %189 : vector<48xf32> to vector<48x1xf32>
    %191 = vector.broadcast %190 : vector<48x1xf32> to vector<48x128xf32>
    %192 = arith.subf %188, %191 : vector<48x128xf32>
    %193 = math.exp %192 : vector<48x128xf32>
    %cst_95 = arith.constant dense<0.000000e+00> : vector<48xf32>
    %194 = vector.multi_reduction <add>, %193, %cst_95 [1] : vector<48x128xf32> to vector<48xf32>
    %195 = vector.shape_cast %194 : vector<48xf32> to vector<48x1xf32>
    %196 = tpu.reciprocal %195 {approx = true} : vector<48x1xf32> -> vector<48x1xf32>
    %197 = vector.broadcast %196 : vector<48x1xf32> to vector<48x128xf32>
    %198 = arith.mulf %193, %197 : vector<48x128xf32>
    %c0_96 = arith.constant 0 : index
    %c0_97 = arith.constant 0 : index
    %c0_98 = arith.constant 0 : index
    %199 = vector.load %arg13[%c0_96, %c0_97, %c0_98] : memref<1x48x128xf32, #tpu.memory_space<vmem>>, vector<1x48x128xf32>
    %200 = vector.shape_cast %199 : vector<1x48x128xf32> to vector<48x128xf32>
    %201 = vector.shape_cast %198 : vector<48x128xf32> to vector<1x48x128xf32>
    tpu.vector_store %arg13[%c0_96, %c0_97, %c0_98], %201 {strides = array<i32>} : memref<1x48x128xf32, #tpu.memory_space<vmem>>, vector<1x48x128xf32>,
    return
  }
  func.func @transform_0(%arg0: i32, %arg1: i32) -> (i32, i32, i32) {
    %c0_i32 = arith.constant 0 : i32
    %c0_i32_0 = arith.constant 0 : i32
    %c0_i32_1 = arith.constant 0 : i32
    return %arg0, %c0_i32, %c0_i32_0 : i32, i32, i32
  }
  func.func @transform_1(%arg0: i32, %arg1: i32) -> (i32, i32) {
    %c0_i32 = arith.constant 0 : i32
    %c0_i32_0 = arith.constant 0 : i32
    %c0_i32_1 = arith.constant 0 : i32
    return %c0_i32, %c0_i32_0 : i32, i32
  }
  func.func @transform_2(%arg0: i32, %arg1: i32) -> (i32, i32) {
    %c0_i32 = arith.constant 0 : i32
    %c0_i32_0 = arith.constant 0 : i32
    %c0_i32_1 = arith.constant 0 : i32
    return %c0_i32, %c0_i32_0 : i32, i32
  }
  func.func @transform_3(%arg0: i32, %arg1: i32) -> (i32, i32) {
    %c0_i32 = arith.constant 0 : i32
    %c0_i32_0 = arith.constant 0 : i32
    %c0_i32_1 = arith.constant 0 : i32
    return %c0_i32, %c0_i32_0 : i32, i32
  }
  func.func @transform_4(%arg0: i32, %arg1: i32) -> (i32, i32) {
    %c0_i32 = arith.constant 0 : i32
    %c0_i32_0 = arith.constant 0 : i32
    %c0_i32_1 = arith.constant 0 : i32
    return %c0_i32, %c0_i32_0 : i32, i32
  }
  func.func @transform_5(%arg0: i32, %arg1: i32) -> (i32, i32) {
    %c0_i32 = arith.constant 0 : i32
    %c0_i32_0 = arith.constant 0 : i32
    %c0_i32_1 = arith.constant 0 : i32
    return %c0_i32, %c0_i32_0 : i32, i32
  }
  func.func @transform_6(%arg0: i32, %arg1: i32) -> (i32, i32, i32) {
    %c0_i32 = arith.constant 0 : i32
    %c0_i32_0 = arith.constant 0 : i32
    %c0_i32_1 = arith.constant 0 : i32
    %c0_i32_2 = arith.constant 0 : i32
    return %c0_i32, %c0_i32_0, %c0_i32_1 : i32, i32, i32
  }
  func.func @transform_7(%arg0: i32, %arg1: i32) -> (i32, i32, i32) {
    %c0_i32 = arith.constant 0 : i32
    %c0_i32_0 = arith.constant 0 : i32
    %c0_i32_1 = arith.constant 0 : i32
    %c0_i32_2 = arith.constant 0 : i32
    return %c0_i32, %c0_i32_0, %c0_i32_1 : i32, i32, i32
  }
  func.func @transform_8(%arg0: i32, %arg1: i32) -> (i32, i32) {
    %c0_i32 = arith.constant 0 : i32
    %c0_i32_0 = arith.constant 0 : i32
    %c0_i32_1 = arith.constant 0 : i32
    return %c0_i32, %c0_i32_0 : i32, i32
  }
  func.func @transform_9(%arg0: i32, %arg1: i32) -> (i32, i32) {
    %c0_i32 = arith.constant 0 : i32
    %c0_i32_0 = arith.constant 0 : i32
    %c0_i32_1 = arith.constant 0 : i32
    return %c0_i32, %c0_i32_0 : i32, i32
  }
  func.func @transform_10(%arg0: i32, %arg1: i32) -> (i32, i32) {
    %c0_i32 = arith.constant 0 : i32
    %c0_i32_0 = arith.constant 0 : i32
    %c0_i32_1 = arith.constant 0 : i32
    return %c0_i32, %c0_i32_0 : i32, i32
  }
  func.func @transform_11(%arg0: i32, %arg1: i32) -> (i32, i32, i32) {
    %c0_i32 = arith.constant 0 : i32
    %c0_i32_0 = arith.constant 0 : i32
    return %arg0, %arg1, %c0_i32 : i32, i32, i32
  }
}

</mosaic_0001>

<bundles_post_ra>
// kernel: tpu_custom_call.1
= control target key start
LH: loop header
LB: loop body
LE: loop exit
PB: predicated region body
PF: predicated region fallthrough
CT: control target
= control target key end

     0   :  { %s6655_s0 = inlined_call_operand.vmem [shape: bf16[2,170,64], index: 0, kind: input, shape index: {}]   ;;  %s6656_s1 = inlined_call_operand.vmem [shape: bf16[56,170], index: 1, kind: input, shape index: {}]   ;;  %s6657_s2 = inlined_call_operand.vmem [shape: bf16[64,128], index: 2, kind: input, shape index: {}]   ;;  %s6658_s3 = inlined_call_operand.vmem [shape: f32[1,128], index: 3, kind: input, shape index: {}]   ;;  %s6659_s4 = inlined_call_operand.vmem [shape: f32[56,128], index: 4, kind: input, shape index: {}]   ;;  %s6660_s5 = inlined_call_operand.vmem [shape: bf16[170,56], index: 5, kind: input, shape index: {}]   ;;  %s6661_s6 = inlined_call_operand.vmem [shape: bf16[9,64,32], index: 6, kind: input, shape index: {}]   ;;  %s6662_s7 = inlined_call_operand.vmem [shape: bf16[9,128,32], index: 7, kind: input, shape index: {}]   ;;  %s6663_s8 = inlined_call_operand.vmem [shape: f32[1,32], index: 8, kind: input, shape index: {}]   ;;  %s6664_s9 = inlined_call_operand.vmem [shape: bf16[32,128], index: 9, kind: input, shape index: {}]   ;;  %s6665_s10 = inlined_call_operand.vmem [shape: f32[1,128], index: 10, kind: input, shape index: {}]   ;;  %s6666_s11 = inlined_call_operand.hbm [shape: f32[2,144,128], index: 11, kind: output, shape index: {}]  }
   0x1   :  { %6674 = sst [smem:[#allocation11_spill]] %s6655_s0 }
   0x2   :  { %16 = vsyncpa [#allocation4], 0 }
   0x3   :  { %18 = vsyncpa [#allocation4 + $0x1], 0  ;;  %s5389_s17 = smov 0   ;;  %s5391_s18 = smov 0  }
   0x4   :  { %s5393_s19 = smov 0   ;;  %s5395_s20 = smov 0  }
   0x5   :  { %s5397_s21 = smov 0   ;;  %s5399_s22 = smov 0  }
   0x6   :  { %s5401_s23 = smov 0   ;;  %s5403_s24 = smov 0  }
   0x7 LB: > { %6675 = sst [smem:[#allocation6_spill]] %s5293_s17  ;;  %s3762_s25 = sadd.s32 4294967295, %s5321_s24   ;;  %s5321_s24 = sphi %s5403_s24, %s24_s24   ;;  %s5317_s23 = sphi %s5401_s23, %s6694_s23   ;;  %s5313_s22 = sphi %s5399_s22, %s6688_s22   ;;  %s5309_s21 = sphi %s5397_s21, %s6693_s21   ;;  %s5305_s20 = sphi %s5395_s20, %s6687_s20   ;;  %s5301_s19 = sphi %s5393_s19, %s6692_s19   ;;  %s5297_s18 = sphi %s5391_s18, %s6691_s18   ;;  %s5293_s17 = sphi %s5389_s17, %s6690_s17  }
   0x8   : > { %6676 = sst [smem:[#allocation7_spill]] %s5313_s22  ;;  %s3763_s26 = sadd.s32 4294967294, %s5321_s24  }
   0x9   : > { %s33_s27 = sadd.s32 1, %s5313_s22  ;;  %s36_s28 = sadd.s32 1, %s5317_s23 }
   0xa   : > { %p34_p0 = scmp.ge.s32.totalorder %s33_s27, 3  ;;  %p291_p1 = scmp.ne.s32.totalorder %s5301_s19, %s5297_s18 }
   0xb   : > { %p292_p2 = scmp.eq.s32.totalorder %s3762_s25, 5  ;;  %p297_p5 = scmp.ne.s32.totalorder %s5297_s18, %s5293_s17 }
   0xc   : > { %s6696_s27 = smov (%p34_p0, %s33_s27), 0  ;;  %s6698_s28 = smov (!%p34_p0, %s36_s28), %s5317_s23 }
   0xd   : > { %6677 = sst [smem:[#allocation8_spill]] %s6696_s27  ;;  %s277_s29 = ssub.s32 %s5313_s22, %s6696_s27 }
   0xe   : > { %p5440_p3 = por %p292_p2, %p291_p1  ;;  %p38_p4 = scmp.ge.s32.totalorder %s6698_s28, 2 }
   0xf   : > { %p298_p6 = scmp.eq.s32.totalorder %s3763_s26, 5  ;;  %p3766_p7 = scmp.ge.s32.totalorder %s5321_s24, 1 }
  0x10   : > { %s6700_s28 = smov (%p38_p4, %s6698_s28), 0  ;;  %p354_p9 = scmp.lt.s32.totalorder %s5321_s24, 7 }
  0x11   : > { %6679 = sst [smem:[#allocation9_spill]] %s6700_s28  ;;  %p5449_p8 = por %p298_p6, %p297_p5 }
  0x12   : > { %s276_s13 = ssub.s32 %s5317_s23, %s6700_s28  ;;  %s281_s14 = sadd.s32 1, %s5301_s19 }
  0x13   : > { %s6680_s12 = scalar_select %p5449_p8, 1, 0 }
  0x14   : > { %s278_s15 = sor.u32 %s277_s29, %s276_s13  ;;  %p355_p10 = pnand %p3766_p7, %p354_p9 }
  0x15   : > { %6681 = sst [smem:[#allocation10_spill]] %s6680_s12  ;;  %p279_p11 = scmp.eq.s32.totalorder %s278_s15, 0 }
  0x16   : > { %358 = sbr.rel (%p355_p10) target bundleno = 1807 (0x70f), region = 64  ;;  %s6672_s25 = sand.u32 (!%p355_p10), 1, %s5297_s18  }
  0x17   : > { %s5458_s16 = scalar_select %p279_p11, %s5301_s19, %s281_s14  }
  0x18   : > { %p394_p12 = scmp.lt.s32.totalorder (!%p355_p10), %s5309_s21, 1  ;;  %s4957_s26 = smul.u32 (!%p355_p10), 48, %s6672_s25 }
  0x19   : > { %s6682_s0 = sld [smem:[#allocation11_spill]] (!%p355_p10)  ;;  %p3768_p13 = scmp.ne.s32.totalorder (!%p355_p10), %s5305_s20, 0 }
  0x1a   : > { %s5470_s29 = scalar_lea.vmem (!%p355_p10), [#allocation3], %s4957_s26 }
  0x1d   : > { %s395_s27 = scalar_select %p394_p12, %s5309_s21, 1 }
  0x1e   : > { %404 = sbr.rel (%p3768_p13) target bundleno = 541 (0x21d), region = 68  ;;  %v5323_v1 = vmov (!%p3768_p13), 0   ;;  %vm532_vm0 = vcmask (!%p3768_p13), 343040   ;;  %v5061_v5 = vld [vmem:[%s6656_s1 + $0x4] ss:$8 sps:$4 sm:$0xff] (!%p3768_p13)   ;;  %vm545_vm1 = vcmask (!%p3768_p13), 1044480  }
  0x1f   : > { %s4958_s22 = smul.u32 88, %s395_s27  ;;  %549 = vmatprep.subr.bf16.mxu0 (!%p3768_p13), %v5323_v1  ;;  %3788 = vmatprep.mubr.msk.bf16.mxu0 (!%p3768_p13), %vm532_vm0, %v5061_v5  ;;  %v5070_v7 = vld [vmem:[%s6657_s2] sm:$0xff] (!%p3768_p13)   ;;  %v5062_v16 = vld [vmem:[%s6656_s1 + $0x14] ss:$8 sps:$4 sm:$0xff] (!%p3768_p13)   ;;  %v5064_v17 = vld [vmem:[%s6656_s1 + $0x10] ss:$8 sps:$4 sm:$0xff] (!%p3768_p13)  }
  0x20   : > { %4379 = vmatprep.subr.bf16.mxu1 (!%p3768_p13), %v5070_v7  ;;  %v5059_v15 = vld [vmem:[%s6656_s1] ss:$8 sps:$4 sm:$0xff] (!%p3768_p13)   ;;  %v5065_v18 = vld [vmem:[%s6656_s1 + $0x24] ss:$8 sps:$4 sm:$0xff] (!%p3768_p13)   ;;  %v433_v19 = vld [vmem:[%s6656_s1 + $0x30] sm:$0xff] (!%p3768_p13)  ;;  %vm656_vm2 = vcmask (!%p3768_p13), 523264  }
  0x21   : > { %s5468_s28 = scalar_lea.vmem %s6682_s0, %s4958_s22  ;;  %4380 = vmatpush3.bf16.msra.mxu1 (!%p3768_p13), %v5070_v7  ;;  %v5067_v20 = vld [vmem:[%s6656_s1 + $0x20] ss:$8 sps:$4 sm:$0xff] (!%p3768_p13)   ;;  %v3776_v21 = vcombine.high (!%p3768_p13), %v433_v19, %v433_v19  ;;  %v3775_v22 = vcombine.low (!%p3768_p13), %v433_v19, %v433_v19  ;;  %v5072_v24 = vld [vmem:[%s6657_s2 + $0x10] sm:$0xff] (!%p3768_p13)   ;;  %v5073_v25 = vld [vmem:[%s6657_s2 + $0x18] sm:$0xff] (!%p3768_p13)  }
  0x22   : > { %v5048_v0 = vld [vmem:[%s5468_s28] sm:$0xff] (!%p3768_p13)   ;;  %v5049_v2 = vld [vmem:[%s5468_s28 + $0x8] sm:$0xff] (!%p3768_p13)   ;;  %v5050_v3 = vld [vmem:[%s5468_s28 + $0x10] sm:$0xff] (!%p3768_p13)  }
  0x23   : > { %550 = vmatpush1.bf16.msra.mxu0 (!%p3768_p13), %v5048_v0  ;;  %v5051_v4 = vld [vmem:[%s5468_s28 + $0x18] sm:$0xff] (!%p3768_p13)   ;;  %v5052_v6 = vld [vmem:[%s5468_s28 + $0x20] sm:$0xff] (!%p3768_p13)   ;;  %v5053_v8 = vld [vmem:[%s5468_s28 + $0x28] sm:$0xff] (!%p3768_p13)  }
  0x24   : > { %551 = vmatprep.subr.bf16.mxu0 (!%p3768_p13), %v5323_v1  ;;  %v5054_v9 = vld [vmem:[%s5468_s28 + $0x30] sm:$0xff] (!%p3768_p13)   ;;  %v5055_v10 = vld [vmem:[%s5468_s28 + $0x38] sm:$0xff] (!%p3768_p13)   ;;  %v5056_v11 = vld [vmem:[%s5468_s28 + $0x40] sm:$0xff] (!%p3768_p13)  }
  0x25   : > { %v5057_v12 = vld [vmem:[%s5468_s28 + $0x48] sm:$0xff]   ;;  %v5058_v13 = vld [vmem:[%s5468_s28 + $0x50] sm:$0x1f]   ;;  %v3792_v46 = vld [vmem:[%s6658_s3] ss:$0 sm:$0xff] }
  0x26   : > { %v547_v14 = vsel %vm545_vm1, %v5058_v13, 0  ;;  %v5071_v23 = vld [vmem:[%s6657_s2 + $0x8] sm:$0xff]   ;;  %v756_v58 = vld [vmem:[%s6659_s4 + $0x10] sm:$0xff]  ;;  %v757_v60 = vld [vmem:[%s6659_s4 + $0x18] sm:$0xff] }
  0x27   : > { %552 = vmatpush1.bf16.msra.mxu0 %v5049_v2  ;;  %4381 = vmatprep.subr.bf16.mxu1 %v5071_v23  ;;  %v754_v62 = vld [vmem:[%s6659_s4] sm:$0xff]  ;;  %v755_v0 = vld [vmem:[%s6659_s4 + $0x8] sm:$0xff] }
  0x28   : > { %553 = vmatprep.subr.bf16.mxu0 %v5323_v1  ;;  %4382 = vmatpush3.bf16.msra.mxu1 %v5071_v23 }
  0x29   : > { %4383 = vmatprep.subr.bf16.mxu1 %v5072_v24 }
  0x2b   : > { %554 = vmatpush1.bf16.msra.mxu0 %v5050_v3 }
  0x2c   : > { %555 = vmatprep.subr.bf16.mxu0 %v5323_v1  ;;  %4384 = vmatpush3.bf16.msra.mxu1 %v5072_v24  ;;  %v759_v24 = vld [vmem:[%s6659_s4 + $0x28] sm:$0xff] }
  0x2d   : > { %4385 = vmatprep.subr.bf16.mxu1 %v5073_v25 }
  0x2f   : > { %556 = vmatpush1.bf16.msra.mxu0 %v5051_v4 }
  0x30   : > { %557 = vmatprep.subr.bf16.mxu0 %v5323_v1  ;;  %4386 = vmatpush3.bf16.msra.mxu1 %v5073_v25 }
  0x33   : > { %558 = vmatpush1.bf16.msra.mxu0 %v5052_v6 }
  0x34   : > { %559 = vmatprep.subr.bf16.mxu0 %v5323_v1 }
  0x37   : > { %560 = vmatpush1.bf16.msra.mxu0 %v5053_v8 }
  0x38   : > { %561 = vmatprep.subr.bf16.mxu0 %v5323_v1 }
  0x3b   : > { %562 = vmatpush1.bf16.msra.mxu0 %v5054_v9 }
  0x3c   : > { %563 = vmatprep.subr.bf16.mxu0 %v5323_v1 }
  0x3f   : > { %564 = vmatpush1.bf16.msra.mxu0 %v5055_v10 }
  0x40   : > { %565 = vmatprep.subr.bf16.mxu0 %v5323_v1 }
  0x43   : > { %566 = vmatpush1.bf16.msra.mxu0 %v5056_v11 }
  0x44   : > { %567 = vmatprep.subr.bf16.mxu0 %v5323_v1 }
  0x47   : > { %568 = vmatpush1.bf16.msra.mxu0 %v5057_v12 }
  0x48   : > { %569 = vmatprep.subr.bf16.mxu0 %v5323_v1 }
  0x4b   : > { %570 = vmatpush1.bf16.msra.mxu0 %v547_v14 }
  0x4e   : > { %582 = vmatmul.mubr.bf16.vlgmr.msra.gmra.mrb[0].mxu0 %v5059_v15  ;;  %v760_v15 = vld [vmem:[%s6659_s4 + $0x30] sm:$0xff] }
  0x4f   : > { %3789 = vmatprep.mubr.msk.bf16.mxu0 %vm532_vm0, %v5062_v16 }
  0x56   : > { %590 = vmatmul.mubr.bf16.gmra.mrb[4].mxu0 %v5064_v17 }
  0x57   : > { %3790 = vmatprep.mubr.msk.bf16.mxu0 %vm532_vm0, %v5065_v18 }
  0x5e   : > { %598 = vmatmul.mubr.bf16.gmra.mrb[8].mxu0 %v5067_v20 }
  0x5f   : > { %3791 = vmatprep.mubr.msk.bf16.mxu0 %vm532_vm0, %v3776_v21 }
  0x66   : > { %606 = vmatmul.mubr.bf16.gmra.mrb[12].mxu0 %v3775_v22  ;;  %v758_v22 = vld [vmem:[%s6659_s4 + $0x20] sm:$0xff] }
 0x121   : > { %v583_v26 = vpop.f32.mrb[0].mxu0 }
 0x122   : > { %v585_v27 = vpop.f32.mrb[1].mxu0 }
 0x123   : > { %v586_v28 = vpop.f32.mrb[2].mxu0 }
 0x124   : > { %v613_v29 = vpack.c.bf16 %v586_v28, %v583_v26  ;;  %v588_v30 = vpop.f32.mrb[3].mxu0 }
 0x126   : > { %4387 = vmatprep.mubr.msk.bf16.mxu1 %vm656_vm2, %v613_v29 }
 0x129   : > { %v591_v31 = vpop.f32.mrb[4].mxu0 }
 0x12a   : > { %v593_v32 = vpop.f32.mrb[5].mxu0 }
 0x12b   : > { %v594_v33 = vpop.f32.mrb[6].mxu0 }
 0x12c   : > { %v614_v34 = vpack.c.bf16 %v594_v33, %v591_v31  ;;  %v596_v35 = vpop.f32.mrb[7].mxu0 }
 0x12e   : > { %4388 = vmatmul.mubr.msk.bf16.vlgmr.msra.gmra.mrb[0].mxu1 %vm656_vm2, %v614_v34 }
 0x131   : > { %v599_v36 = vpop.f32.mrb[8].mxu0 }
 0x132   : > { %v601_v37 = vpop.f32.mrb[9].mxu0 }
 0x133   : > { %v602_v38 = vpop.f32.mrb[10].mxu0 }
 0x134   : > { %v615_v39 = vpack.c.bf16 %v602_v38, %v599_v36  ;;  %v604_v40 = vpop.f32.mrb[11].mxu0 }
 0x136   : > { %4391 = vmatprep.mubr.msk.bf16.mxu1 %vm656_vm2, %v615_v39 }
 0x139   : > { %v607_v41 = vpop.f32.mrb[12].mxu0 }
 0x13a   : > { %v616_v42 = vpack.c.bf16 %v607_v41, %v607_v41  ;;  %v609_v43 = vpop.f32.mrb[13].mxu0 }
 0x13b   : > { %v610_v44 = vpop.f32.mrb[14].mxu0 }
 0x13c   : > { %v611_v45 = vpop.f32.mrb[15].mxu0  ;;  %4392 = vmatmul.mubr.msk.bf16.gmra.mrb[4].mxu1 %vm656_vm2, %v616_v42 }
 0x201   : > { %v4389_v47 = vpop.f32.mrb[0].mxu1 }
 0x202   : > { %v712_v48 = vadd.f32 %v4389_v47, %v3792_v46  ;;  %v703_v49 = vpop.f32.mrb[1].mxu1 }
 0x203   : > { %v704_v50 = vadd.f32 %v3792_v46, %v703_v49  ;;  %v4390_v51 = vpop.f32.mrb[2].mxu1 }
 0x204   : > { %vm735_vm3 = vcmp.ge.f32.partialorder %v712_v48, 0.0  ;;  %v742_v52 = vmul.f32 0.2, %v712_v48  ;;  %v715_v53 = vadd.f32 %v4390_v51, %v3792_v46  ;;  %v706_v54 = vpop.f32.mrb[3].mxu1 }
 0x205   : > { %vm733_vm4 = vcmp.ge.f32.partialorder %v704_v50, 0.0  ;;  %v740_v55 = vmul.f32 0.2, %v704_v50  ;;  %v707_v56 = vadd.f32 %v3792_v46, %v706_v54 }
 0x206   : > { %v749_v57 = vsel %vm735_vm3, %v712_v48, %v742_v52  ;;  %vm736_vm5 = vcmp.ge.f32.partialorder %v715_v53, 0.0  ;;  %v743_v59 = vmul.f32 0.2, %v715_v53 }
 0x207   : > { %v747_v61 = vsel %vm733_vm4, %v704_v50, %v740_v55  ;;  %vm734_vm6 = vcmp.ge.f32.partialorder %v707_v56, 0.0  ;;  %v741_v63 = vmul.f32 0.2, %v707_v56  ;;  %v763_v2 = vmul.f32 %v756_v58, %v749_v57 }
 0x208   : > { %v750_v1 = vsel %vm736_vm5, %v715_v53, %v743_v59  ;;  %v761_v5 = vmul.f32 %v754_v62, %v747_v61 }
 0x209   : > { %v764_v3 = vmul.f32 %v757_v60, %v750_v1  ;;  %v748_v4 = vsel %vm734_vm6, %v707_v56, %v741_v63 }
 0x20a   : > { %v762_v6 = vmul.f32 %v755_v0, %v748_v4 }
 0x20b   : > { %v4186_v7 = vpack.c.bf16 %v764_v3, %v763_v2 }
 0x20c   : > { %v4181_v8 = vpack.c.bf16 %v762_v6, %v761_v5 }
 0x20d   : > { %4193 = vst [vmem:[#allocation2 + $0x8] sm:$0xff] %v4186_v7  }
 0x20e   : > { %4182 = vst [vmem:[#allocation2] sm:$0xff] %v4181_v8  }
 0x20f   : > { %v4393_v9 = vpop.f32.mrb[4].mxu1 }
 0x210   : > { %v728_v10 = vadd.f32 %v4393_v9, %v3792_v46  ;;  %v719_v11 = vpop.f32.mrb[5].mxu1 }
 0x211   : > { %v720_v12 = vadd.f32 %v3792_v46, %v719_v11  ;;  %v4394_v13 = vpop.f32.mrb[6].mxu1 }
 0x212   : > { %vm739_vm7 = vcmp.ge.f32.partialorder %v728_v10, 0.0  ;;  %v746_v14 = vmul.f32 0.2, %v728_v10  ;;  %v722_v16 = vpop.f32.mrb[7].mxu1 }
 0x213   : > { %vm737_vm8 = vcmp.ge.f32.partialorder %v720_v12, 0.0  ;;  %v744_v17 = vmul.f32 0.2, %v720_v12  ;;  %v723_v18 = vadd.f32 %v3792_v46, %v722_v16 }
 0x214   : > { %v753_v19 = vsel %vm739_vm7, %v728_v10, %v746_v14 }
 0x215   : > { %v767_v20 = vmul.f32 %v760_v15, %v753_v19  ;;  %v751_v21 = vsel %vm737_vm8, %v720_v12, %v744_v17  ;;  %vm738_vm9 = vcmp.ge.f32.partialorder %v723_v18, 0.0  ;;  %v745_v23 = vmul.f32 0.2, %v723_v18 }
 0x216   : > { %v765_v27 = vmul.f32 %v758_v22, %v751_v21 }
 0x217   : > { %v4177_v25 = vpack.c.bf16 %v767_v20, %v767_v20  ;;  %v752_v26 = vsel %vm738_vm9, %v723_v18, %v745_v23 }
 0x218   : > { %v766_v28 = vmul.f32 %v759_v24, %v752_v26 }
 0x219   : > { %803 = vst [vmem:[#allocation2 + $0x18] sm:$0xf] %v4177_v25 }
 0x21a   : > { %v4191_v29 = vpack.c.bf16 %v766_v28, %v765_v27 }
 0x21c   : > { %4194 = vst [vmem:[#allocation2 + $0x10] sm:$0xff] %v4191_v29  }
 0x21d PF: > { %v5074_v30 = vld [vmem:[#allocation2] sm:$0xff]   ;;  %v5324_v31 = vmov 0.0   ;;  %v5075_v32 = vld [vmem:[#allocation2 + $0x8] sm:$0xff]   ;;  %vm5325_vm10 = vmmov 0   ;;  %s804_s15 = smul.u32 48, %s5305_s20  ;;  %vm910_vm11 = vcmask 1043456  }
 0x21e   : > { %4395 = vmatprep.subr.bf16.mxu0 %v5324_v31  ;;  %4423 = vmatprep.subr.bf16.mxu1 %v5324_v31  ;;  %v5083_v33 = vld [vmem:[%s6662_s7] sm:$0xff]   ;;  %v5084_v35 = vld [vmem:[%s6662_s7 + $0x8] sm:$0xff]   ;;  %v5085_v37 = vld [vmem:[%s6662_s7 + $0x10] sm:$0xff]   ;;  %vm894_vm12 = vcmask 457728   ;;  %vm1662_vm13 = vcmask 1046528   ;;  %vm1249_vm15 = vcmask 523264  }
 0x21f   : > { %4396 = vmatpush3.bf16.msra.mxu0 %v5074_v30  ;;  %4403 = vmatprep.mubr.msk.bf16.mxu0 %vm5325_vm10, %v5324_v31  ;;  %s5560_s22 = sshra.s32 %s804_s15, 3  ;;  %v5086_v40 = vld [vmem:[%s6662_s7 + $0x18] sm:$0xff]   ;;  %v5087_v41 = vld [vmem:[%s6662_s7 + $0x40] sm:$0xff]   ;;  %v5089_v44 = vld [vmem:[%s6662_s7 + $0x48] sm:$0xff]   ;;  %vm1374_vm14 = vsmask.f32 7424 }
 0x220   : > { %4397 = vmatprep.subr.bf16.mxu0 %v5324_v31  ;;  %4439 = vmatprep.mubr.msk.bf16.mxu1 %vm5325_vm10, %v5324_v31  ;;  %s6673_s27 = sshll.u32 %s5560_s22, 2  ;;  %v5077_v36 = vld [vmem:[#allocation2 + $0x18] ss:$0 sps:$4 sm:$0xff]   ;;  %v5088_v42 = vld [vmem:[%s6662_s7 + $0x20] sm:$0xff]   ;;  %v5090_v45 = vld [vmem:[%s6662_s7 + $0x28] sm:$0xff]   ;;  %s6683_s0 = sshll.u32 %s5560_s22, 2 }
 0x221   : > { %4424 = vmatpush3.bf16.msra.mxu1 %v5083_v33  ;;  %s5572_s17 = scalar_lea.vmem %s6660_s5, %s6673_s27  ;;  %v912_v38 = vsel %vm910_vm11, %v5077_v36, 0  ;;  %v5091_v46 = vld [vmem:[%s6662_s7 + $0x50] sm:$0xff]   ;;  %v5093_v48 = vld [vmem:[%s6662_s7 + $0x58] sm:$0xff]   ;;  %s5637_s27 = scalar_lea.vmem %s5468_s28, %s6683_s0  ;;  %v5095_v53 = vld [vmem:[%s6662_s7 + $0x60] sm:$0xff]   ;;  %vm1947_vm0 = vcmask 1045504   ;;  %vm2503_vm2 = vcmask 1044480  }
 0x222   : > { %4425 = vmatprep.subr.bf16.mxu1 %v5324_v31  ;;  %v5078_v39 = vld [vmem:[%s5572_s17] sm:$0xff]   ;;  %v5079_v43 = vld [vmem:[%s5572_s17 + $0x8] sm:$0xff]   ;;  %v5092_v47 = vld [vmem:[%s6662_s7 + $0x30] sm:$0xff]   ;;  %vm2202_vm1 = vsmask.f32 5376  ;;  %s3674_s0 = smul.u32 6, %s5305_s20 }
 0x223   : > { %v5076_v34 = vld [vmem:[#allocation2 + $0x10] sm:$0xff]   ;;  %4398 = vmatpush3.bf16.msra.mxu0 %v5075_v32  ;;  %v5081_v50 = vld [vmem:[%s5572_s17 + $0x18] sm:$0xff]   ;;  %v5082_v51 = vld [vmem:[%s5572_s17 + $0x20] sm:$0x1f]   ;;  %s4971_s25 = smul.u32 18, %s5309_s21  ;;  %s3682_s15 = sshll.u32 %s5470_s29, 4  ;;  %s6597_s15 = int_to_ptr.vmem [resolvable:$true] %s3682_s15 }
 0x224   : > { %4399 = vmatprep.subr.bf16.mxu0 %v5324_v31  ;;  %v5080_v49 = vld [vmem:[%s5572_s17 + $0x10] sm:$0xff]   ;;  %v5094_v52 = vld [vmem:[%s6662_s7 + $0x38] sm:$0xff]   ;;  %v5097_v54 = vld [vmem:[%s6662_s7 + $0x68] sm:$0xff]   ;;  %s6684_s21 = sand.u32 1, %s5297_s18   ;;  %s5227_s28 = scalar_lea.vmem %s6597_s15, 768 }
 0x225   : > { %4426 = vmatpush3.bf16.msra.mxu1 %v5084_v35  ;;  %v5098_v55 = vld [vmem:[%s6662_s7 + $0x70] sm:$0xff]   ;;  %v5100_v56 = vld [vmem:[%s6662_s7 + $0x78] sm:$0xff]   ;;  %v5096_v60 = vld [vmem:[%s6661_s6] sm:$0xff]   ;;  %s3679_s14 = sadd.s32 %s4971_s25, %s3674_s0  ;;  %p5228_p0 = scmp.ne.s32.totalorder %s6597_s15, %s5227_s28 }
 0x226   : > { %4427 = vmatprep.subr.bf16.mxu1 %v5324_v31  ;;  %v5099_v63 = vld [vmem:[%s6661_s6 + $0x8] sm:$0xff]   ;;  %v5101_v6 = vld [vmem:[%s6661_s6 + $0x10] sm:$0xff]   ;;  %v5102_v13 = vld [vmem:[%s6661_s6 + $0x18] sm:$0xff]   ;;  %s4168_s26 = sshll.u32 %s3679_s14, 7  ;;  %s5326_s22 = smov [#allocation3]  }
 0x227   : > { %4400 = vmatpush3.bf16.msra.mxu0 %v5076_v34  ;;  %v5103_v17 = vld [vmem:[%s6661_s6 + $0x20] sm:$0xff]   ;;  %v5106_v26 = vld [vmem:[%s6661_s6 + $0x28] sm:$0xff]   ;;  %s6595_s12 = scalar_lea.hbm %s6666_s11, %s4168_s26  ;;  %p5229_p1 = pnand %p5228_p0, %p5440_p3 }
 0x228   : > { %4401 = vmatprep.subr.bf16.mxu0 %v5324_v31  ;;  %v809_v35 = vld [vmem:[%s5637_s27] sm:$0xf]  ;;  %v5704_v36 = vld [vmem:[%s5637_s27 + $0x4] sm:$0xf]  ;;  %s5231_s13 = sshll.u32 %s5326_s22, 4  ;;  %s5232_s13 = int_to_ptr.vmem [resolvable:$false] %s5231_s13 }
 0x229   : > { %4428 = vmatpush3.bf16.msra.mxu1 %v5085_v37  ;;  %p5230_p2 = pneg %p5229_p1  ;;  %s5233_s0 = scalar_lea.vmem %s5232_s13, 1536 }
 0x22a   : > { %4429 = vmatprep.subr.bf16.mxu1 %v5324_v31  ;;  %p5234_p4 = scmp.lt.s32.totalorder %s6597_s15, %s5232_s13  ;;  %p5235_p5 = scmp.lt.s32.totalorder %s5233_s0, %s5227_s28 }
 0x22b   : > { %4402 = vmatpush3.bf16.msra.mxu0 %v912_v38 }
 0x22c   : > { %4471 = vmatprep.subr.bf16.mxu0 %v5324_v31  ;;  %p5236_p6 = por %p5235_p5, %p5234_p4 }
 0x22d   : > { %4430 = vmatpush3.bf16.msra.mxu1 %v5086_v40 }
 0x22e   : > { %4404 = vmatmul.mubr.msk.bf16.vlgmr.msra.gmra.mrb[0].mxu0 %vm894_vm12, %v5078_v39  ;;  %4431 = vmatprep.subr.bf16.mxu1 %v5324_v31  ;;  %v5108_v39 = vld [vmem:[%s6661_s6 + $0x30] sm:$0xff]   ;;  %p5237_p7 = pnand %p5236_p6, %p5230_p2 }
 0x22f   : > { %4407 = vmatprep.mubr.msk.bf16.mxu0 %vm5325_vm10, %v5324_v31  ;;  %4472 = vmatpush3.bf16.msra.mxu0 %v5087_v41 }
 0x230   : > { %4473 = vmatprep.subr.bf16.mxu0 %v5324_v31 }
 0x231   : > { %4432 = vmatpush3.bf16.msra.mxu1 %v5088_v42 }
 0x232   : > { %4433 = vmatprep.subr.bf16.mxu1 %v5324_v31 }
 0x233   : > { %4474 = vmatpush3.bf16.msra.mxu0 %v5089_v44 }
 0x234   : > { %4475 = vmatprep.subr.bf16.mxu0 %v5324_v31 }
 0x235   : > { %4434 = vmatpush3.bf16.msra.mxu1 %v5090_v45  ;;  %v5719_v45 = vld [vmem:[%s5637_s27 + $0x8] sm:$0xf] }
 0x236   : > { %4408 = vmatmul.mubr.msk.bf16.gmra.mrb[4].mxu0 %vm894_vm12, %v5079_v43  ;;  %4435 = vmatprep.subr.bf16.mxu1 %v5324_v31 }
 0x237   : > { %4411 = vmatprep.mubr.msk.bf16.mxu0 %vm5325_vm10, %v5324_v31  ;;  %4476 = vmatpush3.bf16.msra.mxu0 %v5091_v46  ;;  %v5722_v46 = vld [vmem:[%s5637_s27 + $0xc] sm:$0xf] }
 0x238   : > { %4477 = vmatprep.subr.bf16.mxu0 %v5324_v31 }
 0x239   : > { %4436 = vmatpush3.bf16.msra.mxu1 %v5092_v47 }
 0x23a   : > { %4437 = vmatprep.subr.bf16.mxu1 %v5324_v31 }
 0x23b   : > { %4478 = vmatpush3.bf16.msra.mxu0 %v5093_v48  ;;  %v5727_v48 = vcombine.low %v809_v35, %v5704_v36 }
 0x23c   : > { %4479 = vmatprep.subr.bf16.mxu0 %v5324_v31 }
 0x23d   : > { %4438 = vmatpush3.bf16.msra.mxu1 %v5094_v52 }
 0x23e   : > { %4412 = vmatmul.mubr.msk.bf16.gmra.mrb[8].mxu0 %vm894_vm12, %v5080_v49  ;;  %4451 = vmatprep.subr.bf16.mxu1 %v5324_v31 }
 0x23f   : > { %4415 = vmatprep.mubr.msk.bf16.mxu0 %vm5325_vm10, %v5324_v31  ;;  %4480 = vmatpush3.bf16.msra.mxu0 %v5095_v53 }
 0x240   : > { %4481 = vmatprep.subr.bf16.mxu0 %v5324_v31 }
 0x243   : > { %4482 = vmatpush3.bf16.msra.mxu0 %v5097_v54  ;;  %v5736_v54 = vcombine.low %v5719_v45, %v5722_v46 }
 0x244   : > { %4483 = vmatprep.subr.bf16.mxu0 %v5324_v31 }
 0x246   : > { %4416 = vmatmul.mubr.msk.bf16.gmra.mrb[12].mxu0 %vm894_vm12, %v5081_v50 }
 0x247   : > { %4419 = vmatprep.mubr.msk.bf16.mxu0 %vm5325_vm10, %v5324_v31  ;;  %4484 = vmatpush3.bf16.msra.mxu0 %v5098_v55  ;;  %v5112_v55 = vld [vmem:[%s6661_s6 + $0x38] sm:$0xff]  }
 0x248   : > { %4485 = vmatprep.subr.bf16.mxu0 %v5324_v31 }
 0x24b   : > { %4486 = vmatpush3.bf16.msra.mxu0 %v5100_v56  ;;  %v1513_v56 = vshll.u32 %v5727_v48, 16 }
 0x24c   : > { %4499 = vmatprep.subr.bf16.mxu0 %v5324_v31 }
 0x24e   : > { %4420 = vmatmul.mubr.msk.bf16.gmra.mrb[16].mxu0 %vm894_vm12, %v5082_v51  ;;  %v5105_v51 = vld [vmem:[%s6662_s7 + $0x80] sm:$0xff]  }
 0x24f   : > { %4487 = vmatprep.mubr.msk.bf16.mxu0 %vm5325_vm10, %v5324_v31 }
 0x301   : > { %v948_v57 = vpop.f32.mrb[0].mxu0 }
 0x302   : > { %v4405_v58 = vpop.f32.mrb[1].mxu0 }
 0x303   : > { %v951_v59 = vpop.f32.mrb[2].mxu0 }
 0x304   : > { %v1093_v61 = vpack.c.bf16 %v951_v59, %v948_v57  ;;  %v4406_v62 = vpop.f32.mrb[3].mxu0 }
 0x306   : > { %4440 = vmatmul.mubr.bf16.vlgmr.msra.gmra.mrb[0].mxu1 %v1093_v61  ;;  %v1378_v0 = vshll.u32 %v1093_v61, 16  ;;  %v1376_v9 = vshrl.u32 %v1093_v61, 16  ;;  %v1663_v10 = vrot.slane %v1093_v61, 1  ;;  %v5107_v61 = vld [vmem:[%s6662_s7 + $0x88] sm:$0xff]  }
 0x307   : > { %4452 = vmatpush3.bf16.msra.mxu1 %v5096_v60  ;;  %4443 = vmatprep.mubr.msk.bf16.mxu1 %vm5325_vm10, %v5324_v31 }
 0x308   : > { %4453 = vmatprep.subr.bf16.mxu1 %v5324_v31  ;;  %v1380_v7 = vrot.slane %v1378_v0, 1 }
 0x309   : > { %v956_v1 = vpop.f32.mrb[4].mxu0 }
 0x30a   : > { %v5668_v2 = vpack.c.bf16 %v956_v1, %v951_v59  ;;  %v4409_v3 = vpop.f32.mrb[5].mxu0  ;;  %v1381_v15 = vor.u32 %v1380_v7, %v1376_v9  ;;  %v5769_v9 = vld [vmem:[%s5637_s27 + $0x14] sm:$0xf] }
 0x30b   : > { %v959_v4 = vpop.f32.mrb[6].mxu0  ;;  %4454 = vmatpush3.bf16.msra.mxu1 %v5099_v63  ;;  %v1511_v63 = vshrl.u32 %v5727_v48, 16  ;;  %v1517_v3 = vshll.u32 %v5736_v54, 16 }
 0x30c   : > { %v4410_v5 = vpop.f32.mrb[7].mxu0  ;;  %4455 = vmatprep.subr.bf16.mxu1 %v5324_v31  ;;  %v1094_v8 = vpack.c.bf16 %v959_v4, %v956_v1  ;;  %v1515_v1 = vrot.slane %v1513_v56, 1  ;;  %v5121_v56 = vld [vmem:[%s6662_s7 + $0xd0] sm:$0xff]  }
 0x30e   : > { %v1383_v11 = vshll.u32 %v1094_v8, 16  ;;  %v1664_v12 = vrot.slane %v1094_v8, 1  ;;  %4444 = vmatmul.mubr.bf16.gmra.mrb[4].mxu1 %v1094_v8  ;;  %v1387_v27 = vshrl.u32 %v1094_v8, 16  ;;  %v5766_v8 = vld [vmem:[%s5637_s27 + $0x10] sm:$0xf] }
 0x30f   : > { %4456 = vmatpush3.bf16.msra.mxu1 %v5101_v6  ;;  %4447 = vmatprep.mubr.msk.bf16.mxu1 %vm5325_vm10, %v5324_v31 }
 0x310   : > { %v1385_v16 = vrot.slane %v1383_v11, 1  ;;  %4457 = vmatprep.subr.bf16.mxu1 %v5324_v31  ;;  %v5684_v18 = vsel %vm1662_vm13, %v1663_v10, %v1664_v12 }
 0x311   : > { %v964_v14 = vpop.f32.mrb[8].mxu0 }
 0x312   : > { %v5686_v19 = vpack.c.bf16 %v964_v14, %v959_v4  ;;  %v4413_v20 = vpop.f32.mrb[9].mxu0  ;;  %v1386_v22 = vsel %vm1374_vm14, %v1381_v15, %v1385_v16  ;;  %v1389_v33 = vor.u32 %v1387_v27, %v1385_v16 }
 0x313   : > { %v967_v21 = vpop.f32.mrb[10].mxu0  ;;  %4488 = vmatmul.mubr.bf16.vlgmr.msra.gmra.mrb[20].mxu0 %v1386_v22  ;;  %4458 = vmatpush3.bf16.msra.mxu1 %v5102_v13  ;;  %v5111_v13 = vld [vmem:[%s6662_s7 + $0x90] sm:$0xff]   ;;  %v1516_v20 = vor.u32 %v1515_v1, %v1511_v63  ;;  %v5786_v22 = vcombine.low %v5766_v8, %v5769_v9  ;;  %v5124_v1 = vld [vmem:[%s6662_s7 + $0xb8] sm:$0xff]  }
 0x314   : > { %v1095_v23 = vpack.c.bf16 %v967_v21, %v964_v14  ;;  %v4414_v24 = vpop.f32.mrb[11].mxu0  ;;  %v2215_v25 = vshll.u32 %v5686_v19, 16  ;;  %4491 = vmatprep.mubr.msk.bf16.mxu0 %vm5325_vm10, %v5324_v31  ;;  %4500 = vmatpush3.bf16.msra.mxu0 %v5103_v17  ;;  %v2212_v30 = vshrl.u32 %v5686_v19, 16 }
 0x315   : > { %4519 = vmatprep.subr.bf16.mxu1 %v5324_v31  ;;  %4501 = vmatprep.subr.bf16.mxu0 %v5324_v31 }
 0x316   : > { %v1391_v28 = vshll.u32 %v1095_v23, 16  ;;  %v1666_v29 = vrot.slane %v1095_v23, 1  ;;  %4448 = vmatmul.mubr.bf16.gmra.mrb[8].mxu1 %v1095_v23  ;;  %v2989_v32 = vrot.slane %v2215_v25, 1  ;;  %v1395_v53 = vshrl.u32 %v1095_v23, 16 }
 0x317   : > { %4459 = vmatprep.mubr.msk.bf16.mxu1 %vm5325_vm10, %v5324_v31 }
 0x318   : > { %v1393_v34 = vrot.slane %v1391_v28, 1  ;;  %v5707_v37 = vsel %vm1662_vm13, %v1664_v12, %v1666_v29  ;;  %4502 = vmatpush3.bf16.msra.mxu0 %v5106_v26  ;;  %v2990_v40 = vor.u32 %v2989_v32, %v2212_v30  ;;  %v5113_v28 = vld [vmem:[%s6662_s7 + $0x98] sm:$0xff]  }
 0x319   : > { %v972_v38 = vpop.f32.mrb[12].mxu0  ;;  %4503 = vmatprep.subr.bf16.mxu0 %v5324_v31 }
 0x31a   : > { %v1347_v41 = vpack.c.bf16 %v972_v38, %v972_v38  ;;  %v5714_v42 = vpack.c.bf16 %v972_v38, %v967_v21  ;;  %v4417_v43 = vpop.f32.mrb[13].mxu0  ;;  %v1394_v44 = vsel %vm1374_vm14, %v1389_v33, %v1393_v34  ;;  %v1397_v59 = vor.u32 %v1395_v53, %v1393_v34  ;;  %v5114_v38 = vld [vmem:[%s6662_s7 + $0xc0] sm:$0xff]   ;;  %v5120_v53 = vld [vmem:[%s6662_s7 + $0xa8] sm:$0xff]  }
 0x31b   : > { %v5724_v47 = vpop.f32.mrb[14].mxu0  ;;  %4492 = vmatmul.mubr.bf16.gmra.mrb[24].mxu0 %v1394_v44  ;;  %v1519_v21 = vrot.slane %v1517_v3, 1  ;;  %v5118_v44 = vld [vmem:[%s6662_s7 + $0xa0] sm:$0xff]  }
 0x31c   : > { %v1399_v49 = vshll.u32 %v1347_v41, 16  ;;  %v1668_v50 = vrot.slane %v1347_v41, 1  ;;  %v4418_v52 = vpop.f32.mrb[15].mxu0  ;;  %4495 = vmatprep.mubr.msk.bf16.mxu0 %vm5325_vm10, %v5324_v31  ;;  %4504 = vmatpush3.bf16.msra.mxu0 %v5108_v39  ;;  %v2224_v57 = vshll.u32 %v5714_v42, 16  ;;  %v2221_v4 = vshrl.u32 %v5714_v42, 16 }
 0x31d   : > { %4505 = vmatprep.subr.bf16.mxu0 %v5324_v31  ;;  %v1520_v35 = vsel %vm1374_vm14, %v1516_v20, %v1519_v21  ;;  %v1521_v39 = vshrl.u32 %v5736_v54, 16  ;;  %v5812_v41 = vld [vmem:[%s5637_s27 + $0x18] sm:$0xf] }
 0x31e   : > { %v1401_v58 = vrot.slane %v1399_v49, 1  ;;  %v5745_v60 = vsel %vm1662_vm13, %v1666_v29, %v1668_v50  ;;  %4460 = vmatmul.mubr.msk.bf16.vlgmr.msra.gmra.mrb[0].mxu1 %vm1249_vm15, %v5727_v48  ;;  %v2991_v5 = vrot.slane %v2224_v57, 1  ;;  %v5119_v49 = vld [vmem:[%s6662_s7 + $0xc8] sm:$0xff]   ;;  %v5827_v52 = vcombine.low %v5812_v41, %v5812_v41 }
 0x31f   : > { %4520 = vmatpush3.bf16.msra.mxu1 %v5105_v51  ;;  %4463 = vmatprep.mubr.msk.bf16.mxu1 %vm5325_vm10, %v5324_v31  ;;  %v1523_v50 = vor.u32 %v1521_v39, %v1519_v21  ;;  %v5136_v21 = vld [vmem:[%s6661_s6 + $0x68] sm:$0xff]   ;;  %v5953_v39 = vcombine.low %v5704_v36, %v5719_v45  ;;  %v5139_v36 = vld [vmem:[%s6662_s7 + $0x110] sm:$0xff]  }
 0x320   : > { %v1402_v62 = vsel %vm1374_vm14, %v1397_v59, %v1401_v58  ;;  %4521 = vmatprep.subr.bf16.mxu1 %v5324_v31  ;;  %4506 = vmatpush3.bf16.msra.mxu0 %v5112_v55  ;;  %v5772_v11 = vsel %vm1374_vm14, %v2990_v40, %v2991_v5  ;;  %v2993_v12 = vor.u32 %v2991_v5, %v2221_v4  ;;  %v1524_v40 = vshll.u32 %v5786_v22, 16  ;;  %v5126_v5 = vld [vmem:[%s6662_s7 + $0xe0] sm:$0xff]  }
 0x321   : > { %v980_v0 = vpop.f32.mrb[16].mxu0  ;;  %4567 = vmatprep.subr.bf16.mxu0 %v5324_v31  ;;  %v1528_v58 = vshrl.u32 %v5786_v22, 16  ;;  %v1532_v59 = vshll.u32 %v5827_v52, 16  ;;  %v2067_v45 = vrot.slane %v5953_v39, 2 }
 0x322   : > { %v5762_v6 = vpack.c.bf16 %v980_v0, %v5724_v47  ;;  %v4421_v7 = vpop.f32.mrb[17].mxu0  ;;  %v1526_v51 = vrot.slane %v1524_v40, 1  ;;  %v5957_v40 = vcombine.low %v5722_v46, %v5766_v8  ;;  %v5141_v8 = vld [vmem:[%s6662_s7 + $0x118] sm:$0xff]  }
 0x323   : > { %v983_v10 = vpop.f32.mrb[18].mxu0  ;;  %4522 = vmatpush3.bf16.msra.mxu1 %v5107_v61  ;;  %4496 = vmatmul.mubr.bf16.gmra.mrb[28].mxu0 %v1402_v62  ;;  %v5122_v61 = vld [vmem:[%s6662_s7 + $0xb0] sm:$0xff]   ;;  %v5123_v62 = vld [vmem:[%s6662_s7 + $0xd8] sm:$0xff]   ;;  %v1534_v0 = vrot.slane %v1532_v59, 1  ;;  %v5127_v7 = vld [vmem:[%s6661_s6 + $0x40] sm:$0xff]  }
 0x324   : > { %v2962_v14 = vpack.c.bf16 %v983_v10, %v983_v10  ;;  %v4422_v15 = vpop.f32.mrb[19].mxu0  ;;  %v2995_v16 = vshll.u32 %v5762_v6, 16  ;;  %v2999_v17 = vshrl.u32 %v5762_v6, 16  ;;  %4523 = vmatprep.subr.bf16.mxu1 %v5324_v31  ;;  %4507 = vmatprep.mubr.msk.bf16.mxu0 %vm5325_vm10, %v5324_v31  ;;  %v3259_v23 = vrot.slane %v5762_v6, 1  ;;  %v5128_v10 = vld [vmem:[%s6662_s7 + $0xe8] sm:$0xff]  }
 0x325   : > { %v1527_v55 = vsel %vm1374_vm14, %v1523_v50, %v1526_v51  ;;  %v1530_v63 = vor.u32 %v1528_v58, %v1526_v51  ;;  %v1949_v15 = vrot.slane %v5686_v19, 2  ;;  %v2068_v46 = vrot.slane %v5957_v40, 2  ;;  %v5143_v58 = vld [vmem:[%s6662_s7 + $0x128] sm:$0xff]  }
 0x326   : > { %v3003_v24 = vshll.u32 %v2962_v14, 16  ;;  %v3261_v26 = vrot.slane %v2962_v14, 1  ;;  %v2997_v27 = vrot.slane %v2995_v16, 1  ;;  %4464 = vmatmul.mubr.msk.bf16.gmra.mrb[4].mxu1 %vm1249_vm15, %v5736_v54  ;;  %v5131_v14 = vld [vmem:[%s6662_s7 + $0xf8] sm:$0xff]   ;;  %v5980_v50 = vcombine.low %v5769_v9, %v5812_v41 }
 0x327   : > { %4524 = vmatpush3.bf16.msra.mxu1 %v5111_v13  ;;  %4467 = vmatprep.mubr.msk.bf16.mxu1 %vm5325_vm10, %v5324_v31  ;;  %v1535_v3 = vsel %vm1374_vm14, %v1530_v63, %v1534_v0  ;;  %v5129_v13 = vld [vmem:[%s6662_s7 + $0xf0] sm:$0xff]   ;;  %v5133_v16 = vld [vmem:[%s6661_s6 + $0x58] sm:$0xff]   ;;  %v2069_v51 = vsel %vm1947_vm0, %v2067_v45, %v2068_v46  ;;  %v2204_v63 = vshrl.u32 %v5668_v2, 16  ;;  %v2207_v0 = vshll.u32 %v5668_v2, 16 }
 0x328   : > { %v3005_v29 = vrot.slane %v3003_v24, 1  ;;  %v5797_v32 = vsel %vm1374_vm14, %v2993_v12, %v2997_v27  ;;  %v3001_v33 = vor.u32 %v2999_v17, %v2997_v27  ;;  %v5802_v34 = vsel %vm1662_vm13, %v3259_v23, %v3261_v26  ;;  %4525 = vmatprep.subr.bf16.mxu1 %v5324_v31  ;;  %v5130_v12 = vld [vmem:[%s6661_s6 + $0x48] sm:$0xff]   ;;  %v5997_v41 = vld [vmem:[%s5637_s27 + $0x1c] sm:$0xf] }
 0x329   : > { %v1948_v17 = vrot.slane %v5668_v2, 2  ;;  %v1951_v24 = vrot.slane %v5714_v42, 2  ;;  %v1782_v26 = vrot.slane %v5727_v48, 1  ;;  %v1783_v27 = vrot.slane %v5736_v54, 1  ;;  %v5135_v48 = vld [vmem:[%s6662_s7 + $0x100] sm:$0xff]   ;;  %v5140_v54 = vld [vmem:[%s6661_s6 + $0x78] sm:$0xff]  }
 0x32a   : > { %v5815_v43 = vsel %vm1374_vm14, %v3001_v33, %v3005_v29  ;;  %v5930_v29 = vpack.c.bf16 %v5724_v47, %v5724_v47  ;;  %v2070_v9 = vrot.slane %v5980_v50, 2  ;;  %v6009_v59 = vcombine.low %v5997_v41, %v5997_v41 }
 0x32b   : > { %4526 = vmatpush3.bf16.msra.mxu1 %v5113_v28  ;;  %4508 = vmatmul.mubr.msk.bf16.vlgmr.msra.gmra.mrb[32].mxu0 %vm1249_vm15, %v1520_v35  ;;  %v1950_v20 = vsel %vm1947_vm0, %v1948_v17, %v1949_v15  ;;  %v5138_v28 = vld [vmem:[%s6661_s6 + $0x70] sm:$0xff]   ;;  %v1784_v33 = vsel %vm1662_vm13, %v1782_v26, %v1783_v27  ;;  %v5137_v35 = vld [vmem:[%s6662_s7 + $0x108] sm:$0xff]   ;;  %v5147_v17 = vld [vmem:[%s6662_s7 + $0x138] sm:$0xff]  }
 0x32c   : > { %4568 = vmatpush3.bf16.msra.mxu0 %v5114_v38  ;;  %4527 = vmatprep.subr.bf16.mxu1 %v5324_v31  ;;  %v1953_v47 = vrot.slane %v5930_v29, 2  ;;  %v1785_v38 = vrot.slane %v5786_v22, 1  ;;  %v2230_v45 = vshrl.u32 %v5930_v29, 16 }
 0x32d   : > { %4569 = vmatprep.subr.bf16.mxu0 %v5324_v31  ;;  %4511 = vmatprep.mubr.msk.bf16.mxu0 %vm5325_vm10, %v5324_v31 }
 0x32e   : > { %4468 = vmatmul.mubr.msk.bf16.gmra.mrb[8].mxu1 %vm1249_vm15, %v5786_v22  ;;  %v1787_v22 = vrot.slane %v5827_v52, 1  ;;  %v5142_v52 = vld [vmem:[%s6662_s7 + $0x120] sm:$0xff]  }
 0x32f   : > { %4528 = vmatpush3.bf16.msra.mxu1 %v5118_v44  ;;  %4535 = vmatprep.mubr.msk.bf16.mxu1 %vm5325_vm10, %v5324_v31  ;;  %v1954_v44 = vsel %vm1947_vm0, %v1951_v24, %v1953_v47  ;;  %v2223_v47 = vrot.slane %v2221_v4, 2  ;;  %v5153_v4 = vld [vmem:[%s6662_s7 + $0x180] sm:$0xff]  }
 0x330   : > { %4570 = vmatpush3.bf16.msra.mxu0 %v5119_v49  ;;  %4529 = vmatprep.subr.bf16.mxu1 %v5324_v31  ;;  %v1786_v49 = vsel %vm1662_vm13, %v1783_v27, %v1785_v38  ;;  %v5150_v27 = vld [vmem:[%s6662_s7 + $0x140] sm:$0xff]  }
 0x331   : > { %4571 = vmatprep.subr.bf16.mxu0 %v5324_v31 }
 0x333   : > { %4530 = vmatpush3.bf16.msra.mxu1 %v5120_v53  ;;  %4512 = vmatmul.mubr.msk.bf16.gmra.mrb[36].mxu0 %vm1249_vm15, %v1527_v55  ;;  %v5144_v53 = vld [vmem:[%s6661_s6 + $0x80] sm:$0xff]   ;;  %v1788_v55 = vsel %vm1662_vm13, %v1785_v38, %v1787_v22  ;;  %v5152_v38 = vld [vmem:[%s6662_s7 + $0x148] sm:$0xff]  }
 0x334   : > { %4572 = vmatpush3.bf16.msra.mxu0 %v5121_v56  ;;  %4531 = vmatprep.subr.bf16.mxu1 %v5324_v31  ;;  %v5146_v56 = vld [vmem:[%s6661_s6 + $0x88] sm:$0xff]  }
 0x335   : > { %4573 = vmatprep.subr.bf16.mxu0 %v5324_v31  ;;  %4515 = vmatprep.mubr.msk.bf16.mxu0 %vm5325_vm10, %v5324_v31  ;;  %v5155_v22 = vld [vmem:[%s6662_s7 + $0x188] sm:$0xff]  }
 0x337   : > { %4532 = vmatpush3.bf16.msra.mxu1 %v5122_v61  ;;  %v2071_v61 = vsel %vm1947_vm0, %v2068_v46, %v2070_v9  ;;  %v2233_v46 = vshll.u32 %v5930_v29, 16 }
 0x338   : > { %4574 = vmatpush3.bf16.msra.mxu0 %v5123_v62  ;;  %4533 = vmatprep.subr.bf16.mxu1 %v5324_v31  ;;  %v5149_v62 = vld [vmem:[%s6661_s6 + $0x90] sm:$0xff]  }
 0x339   : > { %4575 = vmatprep.subr.bf16.mxu0 %v5324_v31 }
 0x33b   : > { %4534 = vmatpush3.bf16.msra.mxu1 %v5124_v1  ;;  %4516 = vmatmul.mubr.msk.bf16.gmra.mrb[40].mxu0 %vm1249_vm15, %v1535_v3  ;;  %v5145_v1 = vld [vmem:[%s6662_s7 + $0x130] sm:$0xff]   ;;  %v2072_v3 = vrot.slane %v6009_v59, 2 }
 0x33c   : > { %4576 = vmatpush3.bf16.msra.mxu0 %v5126_v5  ;;  %4547 = vmatprep.subr.bf16.mxu1 %v5324_v31  ;;  %v2347_v5 = vshrl.u32 %v5953_v39, 16 }
 0x33d   : > { %4577 = vmatprep.subr.bf16.mxu0 %v5324_v31  ;;  %4583 = vmatprep.mubr.msk.bf16.mxu0 %vm5325_vm10, %v5324_v31 }
 0x33e   : > { %4536 = vmatmul.mubr.bf16.vlgmr.msra.gmra.mrb[12].mxu1 %v5684_v18  ;;  %v5132_v18 = vld [vmem:[%s6661_s6 + $0x50] sm:$0xff]  }
 0x33f   : > { %4548 = vmatpush3.bf16.msra.mxu1 %v5127_v7  ;;  %4539 = vmatprep.mubr.msk.bf16.mxu1 %vm5325_vm10, %v5324_v31  ;;  %v2350_v7 = vshll.u32 %v5953_v39, 16 }
 0x340   : > { %4578 = vmatpush3.bf16.msra.mxu0 %v5128_v10  ;;  %4549 = vmatprep.subr.bf16.mxu1 %v5324_v31  ;;  %v2355_v10 = vshrl.u32 %v5957_v40, 16 }
 0x341   : > { %4579 = vmatprep.subr.bf16.mxu0 %v5324_v31 }
 0x343   : > { %4550 = vmatpush3.bf16.msra.mxu1 %v5130_v12  ;;  %v2358_v12 = vshll.u32 %v5957_v40, 16 }
 0x344   : > { %4580 = vmatpush3.bf16.msra.mxu0 %v5129_v13  ;;  %4551 = vmatprep.subr.bf16.mxu1 %v5324_v31  ;;  %v2214_v13 = vrot.slane %v2212_v30, 2  ;;  %v2349_v30 = vrot.slane %v2347_v5, 2  ;;  %v5159_v5 = vld [vmem:[%s6662_s7 + $0x198] sm:$0xff]  }
 0x345   : > { %4581 = vmatprep.subr.bf16.mxu0 %v5324_v31 }
 0x346   : > { %4540 = vmatmul.mubr.bf16.gmra.mrb[16].mxu1 %v5707_v37  ;;  %v5134_v37 = vld [vmem:[%s6661_s6 + $0x60] sm:$0xff]  }
 0x347   : > { %4552 = vmatpush3.bf16.msra.mxu1 %v5132_v18  ;;  %4543 = vmatprep.mubr.msk.bf16.mxu1 %vm5325_vm10, %v5324_v31  ;;  %v2217_v18 = vrot.slane %v2215_v25, 3  ;;  %v2357_v25 = vrot.slane %v2355_v10, 2 }
 0x348   : > { %4582 = vmatpush3.bf16.msra.mxu0 %v5131_v14  ;;  %4553 = vmatprep.subr.bf16.mxu1 %v5324_v31  ;;  %v5151_v14 = vld [vmem:[%s6661_s6 + $0x98] sm:$0xff]  }
 0x349   : > { %4595 = vmatprep.subr.bf16.mxu0 %v5324_v31 }
 0x34b   : > { %4584 = vmatmul.mubr.bf16.vlgmr.msra.gmra.mrb[44].mxu0 %v1950_v20  ;;  %4554 = vmatpush3.bf16.msra.mxu1 %v5133_v16  ;;  %v2209_v16 = vrot.slane %v2207_v0, 3  ;;  %v2352_v20 = vrot.slane %v2350_v7, 3 }
 0x34c   : > { %4587 = vmatprep.mubr.msk.bf16.mxu0 %vm5325_vm10, %v5324_v31  ;;  %4596 = vmatpush3.bf16.msra.mxu0 %v5134_v37  ;;  %v2073_v37 = vsel %vm1947_vm0, %v2070_v9, %v2072_v3  ;;  %v2232_v9 = vrot.slane %v2230_v45, 2  ;;  %v5158_v3 = vld [vmem:[%s6662_s7 + $0x160] sm:$0xff]  }
 0x34d   : > { %4615 = vmatprep.subr.bf16.mxu1 %v5324_v31  ;;  %4597 = vmatprep.subr.bf16.mxu0 %v5324_v31  ;;  %v5174_v45 = vld [vmem:[%s6662_s7 + $0x1c0] sm:$0xff]  }
 0x34e   : > { %4544 = vmatmul.mubr.bf16.gmra.mrb[20].mxu1 %v5745_v60  ;;  %v1952_v60 = vsel %vm1947_vm0, %v1949_v15, %v1951_v24  ;;  %v2206_v15 = vrot.slane %v2204_v63, 2  ;;  %v2218_v24 = vor.u32 %v2217_v18, %v2214_v13  ;;  %v5160_v18 = vld [vmem:[%s6662_s7 + $0x168] sm:$0xff]  }
 0x34f   : > { %4555 = vmatprep.mubr.msk.bf16.mxu1 %vm5325_vm10, %v5324_v31 }
 0x350   : > { %4598 = vmatpush3.bf16.msra.mxu0 %v5136_v21  ;;  %v2360_v21 = vrot.slane %v2358_v12, 3  ;;  %v2210_v26 = vor.u32 %v2209_v16, %v2206_v15  ;;  %v5161_v15 = vld [vmem:[%s6662_s7 + $0x1a0] sm:$0xff]   ;;  %v5162_v16 = vld [vmem:[%s6662_s7 + $0x170] sm:$0xff]  }
 0x351   : > { %4599 = vmatprep.subr.bf16.mxu0 %v5324_v31 }
 0x353   : > { %4588 = vmatmul.mubr.bf16.gmra.mrb[48].mxu0 %v1952_v60  ;;  %v2361_v60 = vor.u32 %v2360_v21, %v2357_v25  ;;  %v2504_v25 = vrot.slane %v5668_v2, 3  ;;  %v5166_v21 = vld [vmem:[%s6661_s6 + $0xa0] sm:$0xff]   ;;  %v5168_v2 = vld [vmem:[%s6661_s6 + $0xa8] sm:$0xff]  }
 0x354   : > { %4591 = vmatprep.mubr.msk.bf16.mxu0 %vm5325_vm10, %v5324_v31  ;;  %4600 = vmatpush3.bf16.msra.mxu0 %v5138_v28  ;;  %v2353_v28 = vor.u32 %v2352_v20, %v2349_v30  ;;  %v5165_v30 = vld [vmem:[%s6662_s7 + $0x1b0] sm:$0xff]   ;;  %v2505_v20 = vrot.slane %v5686_v19, 3 }
 0x355   : > { %4601 = vmatprep.subr.bf16.mxu0 %v5324_v31 }
 0x356   : > { %4556 = vmatmul.mubr.msk.bf16.vlgmr.msra.gmra.mrb[12].mxu1 %vm1249_vm15, %v1784_v33  ;;  %v2364_v33 = vshrl.u32 %v5980_v50, 16 }
 0x357   : > { %4616 = vmatpush3.bf16.msra.mxu1 %v5135_v48  ;;  %4559 = vmatprep.mubr.msk.bf16.mxu1 %vm5325_vm10, %v5324_v31  ;;  %v2367_v48 = vshll.u32 %v5980_v50, 16 }
 0x358   : > { %4617 = vmatprep.subr.bf16.mxu1 %v5324_v31  ;;  %4602 = vmatpush3.bf16.msra.mxu0 %v5140_v54  ;;  %v2219_v54 = vsel %vm2202_vm1, %v2210_v26, %v2218_v24  ;;  %v2506_v26 = vsel %vm2503_vm2, %v2504_v25, %v2505_v20  ;;  %v5192_v25 = vld [vmem:[%s6662_s7 + $0x220] sm:$0xff]  }
 0x359   : > { %4643 = vmatprep.subr.bf16.mxu0 %v5324_v31 }
 0x35b   : > { %4618 = vmatpush3.bf16.msra.mxu1 %v5137_v35  ;;  %4592 = vmatmul.mubr.bf16.gmra.mrb[52].mxu0 %v1954_v44  ;;  %v2226_v35 = vrot.slane %v2224_v57, 3  ;;  %v2362_v44 = vsel %vm2202_vm1, %v2353_v28, %v2361_v60  ;;  %v2366_v57 = vrot.slane %v2364_v33, 2  ;;  %v5170_v28 = vld [vmem:[%s6661_s6 + $0xc0] sm:$0xff]  }
 0x35c   : > { %4619 = vmatprep.subr.bf16.mxu1 %v5324_v31  ;;  %4603 = vmatprep.mubr.msk.bf16.mxu0 %vm5325_vm10, %v5324_v31 }
 0x35e   : > { %4560 = vmatmul.mubr.msk.bf16.gmra.mrb[16].mxu1 %vm1249_vm15, %v1786_v49  ;;  %v2369_v49 = vrot.slane %v2367_v48, 3 }
 0x35f   : > { %4620 = vmatpush3.bf16.msra.mxu1 %v5139_v36  ;;  %4563 = vmatprep.mubr.msk.bf16.mxu1 %vm5325_vm10, %v5324_v31  ;;  %v2227_v36 = vor.u32 %v2226_v35, %v2223_v47  ;;  %v5171_v47 = vld [vmem:[%s6661_s6 + $0xc8] sm:$0xff]   ;;  %v5172_v35 = vld [vmem:[%s6661_s6 + $0xb8] sm:$0xff]  }
 0x360   : > { %4621 = vmatprep.subr.bf16.mxu1 %v5324_v31 }
 0x363   : > { %4622 = vmatpush3.bf16.msra.mxu1 %v5141_v8  ;;  %4604 = vmatmul.mubr.msk.bf16.vlgmr.msra.gmra.mrb[44].mxu0 %vm1249_vm15, %v2069_v51  ;;  %v5154_v8 = vld [vmem:[%s6662_s7 + $0x150] sm:$0xff]   ;;  %v2370_v51 = vor.u32 %v2369_v49, %v2366_v57  ;;  %v2619_v57 = vrot.slane %v5953_v39, 3  ;;  %v2620_v49 = vrot.slane %v5957_v40, 3  ;;  %v5176_v39 = vld [vmem:[%s6662_s7 + $0x1c8] sm:$0xff]  }
 0x364   : > { %4623 = vmatprep.subr.bf16.mxu1 %v5324_v31  ;;  %4607 = vmatprep.mubr.msk.bf16.mxu0 %vm5325_vm10, %v5324_v31 }
 0x365   : > { %4644 = vmatpush3.bf16.msra.mxu0 %v5144_v53  ;;  %v2373_v53 = vshrl.u32 %v6009_v59, 16 }
 0x366   : > { %4564 = vmatmul.mubr.msk.bf16.gmra.mrb[20].mxu1 %vm1249_vm15, %v1788_v55  ;;  %4645 = vmatprep.subr.bf16.mxu0 %v5324_v31  ;;  %v2376_v55 = vshll.u32 %v6009_v59, 16 }
 0x367   : > { %4624 = vmatpush3.bf16.msra.mxu1 %v5142_v52  ;;  %4631 = vmatprep.mubr.msk.bf16.mxu1 %vm5325_vm10, %v5324_v31  ;;  %v2228_v52 = vsel %vm2202_vm1, %v2218_v24, %v2227_v36  ;;  %v2375_v63 = vrot.slane %v2373_v53, 2  ;;  %v5167_v24 = vld [vmem:[%s6662_s7 + $0x1b8] sm:$0xff]   ;;  %v5181_v53 = vld [vmem:[%s6661_s6 + $0xe8] sm:$0xff]  }
 0x368   : > { %4625 = vmatprep.subr.bf16.mxu1 %v5324_v31  ;;  %v2378_v0 = vrot.slane %v2376_v55, 3  ;;  %v5178_v55 = vld [vmem:[%s6662_s7 + $0x1d8] sm:$0xff]  }
 0x369   : > { %4646 = vmatpush3.bf16.msra.mxu0 %v5146_v56  ;;  %v2235_v56 = vrot.slane %v2233_v46, 3  ;;  %v2622_v46 = vrot.slane %v5980_v50, 3 }
 0x36a   : > { %4647 = vmatprep.subr.bf16.mxu0 %v5324_v31  ;;  %v2379_v7 = vor.u32 %v2378_v0, %v2375_v63  ;;  %v3115_v0 = vrot.slane %v2358_v12, 1 }
 0x36b   : > { %4626 = vmatpush3.bf16.msra.mxu1 %v5143_v58  ;;  %4608 = vmatmul.mubr.msk.bf16.gmra.mrb[48].mxu0 %vm1249_vm15, %v2071_v61  ;;  %v5156_v58 = vld [vmem:[%s6662_s7 + $0x158] sm:$0xff]   ;;  %v2371_v61 = vsel %vm2202_vm1, %v2361_v60, %v2370_v51  ;;  %v5169_v60 = vld [vmem:[%s6661_s6 + $0xb0] sm:$0xff]  }
 0x36c   : > { %4627 = vmatprep.subr.bf16.mxu1 %v5324_v31  ;;  %4611 = vmatprep.mubr.msk.bf16.mxu0 %vm5325_vm10, %v5324_v31  ;;  %v3116_v12 = vor.u32 %v3115_v0, %v2355_v10  ;;  %v5189_v10 = vld [vmem:[%s6662_s7 + $0x208] sm:$0xff]  }
 0x36d   : > { %4648 = vmatpush3.bf16.msra.mxu0 %v5149_v62  ;;  %v5157_v62 = vld [vmem:[%s6662_s7 + $0x190] sm:$0xff]  }
 0x36e   : > { %4649 = vmatprep.subr.bf16.mxu0 %v5324_v31 }
 0x36f   : > { %4628 = vmatpush3.bf16.msra.mxu1 %v5145_v1  ;;  %v2236_v1 = vor.u32 %v2235_v56, %v2232_v9  ;;  %v5184_v9 = vld [vmem:[%s6661_s6 + $0xf0] sm:$0xff]  }
 0x370   : > { %4629 = vmatprep.subr.bf16.mxu1 %v5324_v31 }
 0x371   : > { %4650 = vmatpush3.bf16.msra.mxu0 %v5151_v14  ;;  %v2237_v13 = vsel %vm2202_vm1, %v2227_v36, %v2236_v1  ;;  %v2380_v14 = vsel %vm2202_vm1, %v2370_v51, %v2379_v7  ;;  %v2621_v36 = vsel %vm2503_vm2, %v2619_v57, %v2620_v49  ;;  %v5177_v51 = vld [vmem:[%s6662_s7 + $0x1d0] sm:$0xff]   ;;  %v3117_v1 = vrot.slane %v2367_v48, 1  ;;  %v5188_v7 = vld [vmem:[%s6662_s7 + $0x200] sm:$0xff]  }
 0x372   : > { %4711 = vmatprep.subr.bf16.mxu0 %v5324_v31  ;;  %v3256_v57 = vrot.slane %v5686_v19, 1 }
 0x373   : > { %4630 = vmatpush3.bf16.msra.mxu1 %v5147_v17  ;;  %4612 = vmatmul.mubr.msk.bf16.gmra.mrb[52].mxu0 %vm1249_vm15, %v2073_v37  ;;  %v5163_v17 = vld [vmem:[%s6662_s7 + $0x1a8] sm:$0xff]   ;;  %v5164_v37 = vld [vmem:[%s6662_s7 + $0x178] sm:$0xff]   ;;  %v3119_v48 = vor.u32 %v3117_v1, %v2364_v33  ;;  %v5190_v33 = vld [vmem:[%s6662_s7 + $0x210] sm:$0xff]  }
 0x374   : > { %4663 = vmatprep.subr.bf16.mxu1 %v5324_v31  ;;  %4651 = vmatprep.mubr.msk.bf16.mxu0 %vm5325_vm10, %v5324_v31 }
 0x376   : > { %4632 = vmatmul.mubr.bf16.vlgmr.msra.gmra.mrb[24].mxu1 %v2219_v54 }
 0x377   : > { %4664 = vmatpush3.bf16.msra.mxu1 %v5150_v27  ;;  %4635 = vmatprep.mubr.msk.bf16.mxu1 %vm5325_vm10, %v5324_v31  ;;  %v2507_v27 = vrot.slane %v5714_v42, 3 }
 0x378   : > { %4665 = vmatprep.subr.bf16.mxu1 %v5324_v31 }
 0x379   : > { %v2508_v54 = vsel %vm2503_vm2, %v2505_v20, %v2507_v27  ;;  %v987_v20 = vlaneseq }
 0x37b   : > { %4666 = vmatpush3.bf16.msra.mxu1 %v5152_v38  ;;  %4652 = vmatmul.mubr.msk.bf16.vlgmr.msra.gmra.mrb[56].mxu0 %vm1249_vm15, %v2362_v44  ;;  %v2509_v38 = vrot.slane %v5930_v29, 3  ;;  %v5173_v44 = vld [vmem:[%s6661_s6 + $0xd0] sm:$0xff]   ;;  %v5175_v29 = vld [vmem:[%s6661_s6 + $0xd8] sm:$0xff]  }
 0x37c   : > { %4712 = vmatpush3.bf16.msra.mxu0 %v5153_v4  ;;  %4667 = vmatprep.subr.bf16.mxu1 %v5324_v31 }
 0x37d   : > { %4713 = vmatprep.subr.bf16.mxu0 %v5324_v31  ;;  %4655 = vmatprep.mubr.msk.bf16.mxu0 %vm5325_vm10, %v5324_v31  ;;  %v2510_v4 = vsel %vm2503_vm2, %v2507_v27, %v2509_v38  ;;  %v3257_v38 = vrot.slane %v5714_v42, 1 }
 0x37e   : > { %4636 = vmatmul.mubr.bf16.gmra.mrb[28].mxu1 %v2228_v52  ;;  %v2624_v52 = vrot.slane %v6009_v59, 3  ;;  %v817_v59 = vld [vmem:[%s5637_s27 + $0x20] sm:$0xf] }
 0x37f   : > { %4668 = vmatpush3.bf16.msra.mxu1 %v5154_v8  ;;  %4639 = vmatprep.mubr.msk.bf16.mxu1 %vm5325_vm10, %v5324_v31  ;;  %v5179_v8 = vld [vmem:[%s6661_s6 + $0xe0] sm:$0xff]   ;;  %v6269_v63 = vcombine.low %v5997_v41, %v817_v59  ;;  %v5185_v41 = vld [vmem:[%s6662_s7 + $0x1f0] sm:$0xff]   ;;  %v5198_v59 = vld [vmem:[%s6661_s6 + $0x108] sm:$0xff]  }
 0x380   : > { %4714 = vmatpush3.bf16.msra.mxu0 %v5155_v22  ;;  %4669 = vmatprep.subr.bf16.mxu1 %v5324_v31  ;;  %v2623_v22 = vsel %vm2503_vm2, %v2620_v49, %v2622_v46  ;;  %v2625_v56 = vsel %vm2503_vm2, %v2622_v46, %v2624_v52 }
 0x381   : > { %4715 = vmatprep.subr.bf16.mxu0 %v5324_v31 }
 0x383   : > { %4670 = vmatpush3.bf16.msra.mxu1 %v5156_v58  ;;  %4656 = vmatmul.mubr.msk.bf16.gmra.mrb[60].mxu0 %vm1249_vm15, %v2371_v61  ;;  %v5180_v58 = vld [vmem:[%s6662_s7 + $0x1e0] sm:$0xff]   ;;  %v5186_v61 = vld [vmem:[%s6661_s6 + $0xf8] sm:$0xff]  }
 0x384   : > { %4716 = vmatpush3.bf16.msra.mxu0 %v5157_v62  ;;  %4671 = vmatprep.subr.bf16.mxu1 %v5324_v31  ;;  %v5182_v62 = vld [vmem:[%s6662_s7 + $0x1e8] sm:$0xff]  }
 0x385   : > { %4717 = vmatprep.subr.bf16.mxu0 %v5324_v31  ;;  %4659 = vmatprep.mubr.msk.bf16.mxu0 %vm5325_vm10, %v5324_v31 }
 0x386   : > { %4640 = vmatmul.mubr.bf16.gmra.mrb[32].mxu1 %v2237_v13  ;;  %v3120_v13 = vshll.u32 %v6269_v63, 16 }
 0x387   : > { %4672 = vmatpush3.bf16.msra.mxu1 %v5158_v3  ;;  %4679 = vmatprep.mubr.msk.bf16.mxu1 %vm5325_vm10, %v5324_v31  ;;  %v5187_v3 = vld [vmem:[%s6662_s7 + $0x1f8] sm:$0xff]  }
 0x388   : > { %4718 = vmatpush3.bf16.msra.mxu0 %v5159_v5  ;;  %4673 = vmatprep.subr.bf16.mxu1 %v5324_v31  ;;  %v3118_v5 = vsel %vm1374_vm14, %v3116_v12, %v3117_v1 }
 0x389   : > { %4719 = vmatprep.subr.bf16.mxu0 %v5324_v31 }
 0x38b   : > { %4674 = vmatpush3.bf16.msra.mxu1 %v5160_v18  ;;  %4660 = vmatmul.mubr.msk.bf16.gmra.mrb[64].mxu0 %vm1249_vm15, %v2380_v14  ;;  %v3122_v18 = vrot.slane %v3120_v13, 1  ;;  %v6306_v14 = vld [vmem:[%s5637_s27 + $0x24] ss:$0 sps:$4 sm:$0x11]   ;;  %s6603_s27 = scalar_lea.sflag [#allocation4], %s6684_s21 }
 0x38c   : > { %4720 = vmatpush3.bf16.msra.mxu0 %v5161_v15  ;;  %4675 = vmatprep.subr.bf16.mxu1 %v5324_v31 }
 0x38d   : > { %4721 = vmatprep.subr.bf16.mxu0 %v5324_v31  ;;  %4727 = vmatprep.mubr.msk.bf16.mxu0 %vm5325_vm10, %v5324_v31  ;;  %v3123_v15 = vsel %vm1374_vm14, %v3119_v48, %v3122_v18  ;;  %v5199_v48 = vld [vmem:[%s6661_s6 + $0x110] sm:$0xff]  }
 0x38f   : > { %4676 = vmatpush3.bf16.msra.mxu1 %v5162_v16  ;;  %v3124_v16 = vshrl.u32 %v6269_v63, 16 }
 0x390   : > { %4722 = vmatpush3.bf16.msra.mxu0 %v5163_v17  ;;  %4677 = vmatprep.subr.bf16.mxu1 %v5324_v31  ;;  %v3128_v17 = vshll.u32 %v6306_v14, 16 }
 0x391   : > { %4723 = vmatprep.subr.bf16.mxu0 %v5324_v31 }
 0x393   : > { %4678 = vmatpush3.bf16.msra.mxu1 %v5164_v37  ;;  %v3126_v37 = vor.u32 %v3124_v16, %v3122_v18 }
 0x394   : > { %4724 = vmatpush3.bf16.msra.mxu0 %v5165_v30  ;;  %4691 = vmatprep.subr.bf16.mxu1 %v5324_v31  ;;  %v3130_v30 = vrot.slane %v3128_v17, 1 }
 0x395   : > { %4725 = vmatprep.subr.bf16.mxu0 %v5324_v31 }
 0x396   : > { %4680 = vmatmul.mubr.bf16.vlgmr.msra.gmra.mrb[36].mxu1 %v2506_v26 }
 0x397   : > { %4692 = vmatpush3.bf16.msra.mxu1 %v5166_v21  ;;  %4683 = vmatprep.mubr.msk.bf16.mxu1 %vm5325_vm10, %v5324_v31  ;;  %v3131_v21 = vsel %vm1374_vm14, %v3126_v37, %v3130_v30  ;;  %v5200_v37 = vld [vmem:[%s6661_s6 + $0x118] sm:$0xff]   ;;  %v3373_v30 = vrot.slane %v5957_v40, 1 }
 0x398   : > { %4726 = vmatpush3.bf16.msra.mxu0 %v5167_v24  ;;  %4693 = vmatprep.subr.bf16.mxu1 %v5324_v31  ;;  %v988_v24 = vshrl.u32 %v987_v20, 7  ;;  %v3374_v20 = vrot.slane %v5980_v50, 1 }
 0x399   : > { %4739 = vmatprep.subr.bf16.mxu0 %v5324_v31 }
 0x39a   : > { %v989_v26 = vadd.s32 8, %v988_v24 }
 0x39b   : > { %4728 = vmatmul.mubr.bf16.vlgmr.msra.gmra.mrb[68].mxu0 %v5686_v19  ;;  %4694 = vmatpush3.bf16.msra.mxu1 %v5168_v2  ;;  %v5195_v2 = vld [vmem:[%s6662_s7 + $0x230] sm:$0xff]   ;;  %v5197_v19 = vld [vmem:[%s6661_s6 + $0x100] sm:$0xff]  }
 0x39c   : > { %4695 = vmatprep.subr.bf16.mxu1 %v5324_v31  ;;  %4731 = vmatprep.mubr.msk.bf16.mxu0 %vm5325_vm10, %v5324_v31 }
 0x39d   : > { %4740 = vmatpush3.bf16.msra.mxu0 %v5170_v28  ;;  %v6354_v27 = vmul.u32.u64.low 2863311531, %v988_v24  ;;  %v6355_v28 = vmul.u32.u64.high 2863311531, %v988_v24, %v6354_v27 }
 0x39e   : > { %4684 = vmatmul.mubr.bf16.gmra.mrb[40].mxu1 %v2508_v54  ;;  %4741 = vmatprep.subr.bf16.mxu0 %v5324_v31 }
 0x39f   : > { %4696 = vmatpush3.bf16.msra.mxu1 %v5169_v60  ;;  %4687 = vmatprep.mubr.msk.bf16.mxu1 %vm5325_vm10, %v5324_v31  ;;  %v6358_v60 = vmul.u32.u64.low 2863311531, %v989_v26  ;;  %v6359_v54 = vmul.u32.u64.high 2863311531, %v989_v26, %v6358_v60  ;;  %v1000_v49 = vshrl.u32 %v6355_v28, 3 }
 0x3a0   : > { %4697 = vmatprep.subr.bf16.mxu1 %v5324_v31  ;;  %v3375_v60 = vsel %vm1662_vm13, %v3373_v30, %v3374_v20 }
 0x3a1   : > { %4742 = vmatpush3.bf16.msra.mxu0 %v5171_v47  ;;  %v6365_v47 = vadd.s32 16, %v988_v24  ;;  %v1011_v46 = vshrl.u32 %v6359_v54, 3 }
 0x3a2   : > { %4743 = vmatprep.subr.bf16.mxu0 %v5324_v31 }
 0x3a3   : > { %4732 = vmatmul.mubr.bf16.gmra.mrb[72].mxu0 %v5714_v42  ;;  %4698 = vmatpush3.bf16.msra.mxu1 %v5172_v35  ;;  %v3258_v42 = vsel %vm1662_vm13, %v3256_v57, %v3257_v38 }
 0x3a4   : > { %4735 = vmatprep.mubr.msk.bf16.mxu0 %vm5325_vm10, %v5324_v31  ;;  %4759 = vmatprep.subr.bf16.mxu1 %v5324_v31 }
 0x3a5   : > { %4744 = vmatpush3.bf16.msra.mxu0 %v5173_v44  ;;  %v6371_v44 = vadd.s32 24, %v988_v24 }
 0x3a6   : > { %4688 = vmatmul.mubr.bf16.gmra.mrb[44].mxu1 %v2510_v4  ;;  %4745 = vmatprep.subr.bf16.mxu0 %v5324_v31 }
 0x3a7   : > { %4699 = vmatprep.mubr.msk.bf16.mxu1 %vm5325_vm10, %v5324_v31 }
 0x3a9   : > { %4746 = vmatpush3.bf16.msra.mxu0 %v5175_v29 }
 0x3aa   : > { %4787 = vmatprep.subr.bf16.mxu0 %v5324_v31 }
 0x3ab   : > { %4736 = vmatmul.mubr.bf16.gmra.mrb[76].mxu0 %v5762_v6 }
 0x3ac   : > { %4747 = vmatprep.mubr.msk.bf16.mxu0 %vm5325_vm10, %v5324_v31 }
 0x3ae   : > { %4700 = vmatmul.mubr.msk.bf16.vlgmr.msra.gmra.mrb[36].mxu1 %vm1249_vm15, %v2621_v36 }
 0x3af   : > { %4760 = vmatpush3.bf16.msra.mxu1 %v5174_v45  ;;  %4703 = vmatprep.mubr.msk.bf16.mxu1 %vm5325_vm10, %v5324_v31  ;;  %v6379_v36 = vmul.u32.u64.low 2863311531, %v6365_v47  ;;  %v6380_v45 = vmul.u32.u64.high 2863311531, %v6365_v47, %v6379_v36 }
 0x3b0   : > { %4761 = vmatprep.subr.bf16.mxu1 %v5324_v31  ;;  %v3376_v36 = vrot.slane %v6269_v63, 1 }
 0x3b3   : > { %4762 = vmatpush3.bf16.msra.mxu1 %v5176_v39  ;;  %4748 = vmatmul.mubr.msk.bf16.vlgmr.msra.gmra.mrb[68].mxu0 %vm1249_vm15, %v5957_v40 }
 0x3b4   : > { %4763 = vmatprep.subr.bf16.mxu1 %v5324_v31  ;;  %4751 = vmatprep.mubr.msk.bf16.mxu0 %vm5325_vm10, %v5324_v31 }
 0x3b5   : > { %4788 = vmatpush3.bf16.msra.mxu0 %v5179_v8 }
 0x3b6   : > { %4704 = vmatmul.mubr.msk.bf16.gmra.mrb[40].mxu1 %vm1249_vm15, %v2623_v22  ;;  %4789 = vmatprep.subr.bf16.mxu0 %v5324_v31  ;;  %v6386_v8 = vmul.u32.u64.low 2863311531, %v6371_v44  ;;  %v6387_v22 = vmul.u32.u64.high 2863311531, %v6371_v44, %v6386_v8 }
 0x3b7   : > { %4764 = vmatpush3.bf16.msra.mxu1 %v5177_v51  ;;  %4707 = vmatprep.mubr.msk.bf16.mxu1 %vm5325_vm10, %v5324_v31  ;;  %v1001_v51 = vmul.u32 12, %v1000_v49 }
 0x3b8   : > { %4765 = vmatprep.subr.bf16.mxu1 %v5324_v31 }
 0x3b9   : > { %4790 = vmatpush3.bf16.msra.mxu0 %v5181_v53  ;;  %v6393_v53 = vadd.s32 32, %v988_v24 }
 0x3ba   : > { %4791 = vmatprep.subr.bf16.mxu0 %v5324_v31 }
 0x3bb   : > { %4766 = vmatpush3.bf16.msra.mxu1 %v5178_v55  ;;  %4752 = vmatmul.mubr.msk.bf16.gmra.mrb[72].mxu0 %vm1249_vm15, %v5980_v50  ;;  %v3260_v55 = vsel %vm1662_vm13, %v3257_v38, %v3259_v23  ;;  %v1002_v23 = vsub.s32 %v988_v24, %v1001_v51 }
 0x3bc   : > { %4767 = vmatprep.subr.bf16.mxu1 %v5324_v31  ;;  %4755 = vmatprep.mubr.msk.bf16.mxu0 %vm5325_vm10, %v5324_v31 }
 0x3bd   : > { %4792 = vmatpush3.bf16.msra.mxu0 %v5184_v9  ;;  %v1012_v9 = vmul.u32 12, %v1011_v46  ;;  %vm1060_vm3 = vcmp.ne.s32.totalorder %v1002_v23, 0  ;;  %vm1066_vm4 = vcmp.lt.s32.totalorder %v1002_v23, 0 }
 0x3be   : > { %4708 = vmatmul.mubr.msk.bf16.gmra.mrb[44].mxu1 %vm1249_vm15, %v2625_v56  ;;  %4793 = vmatprep.subr.bf16.mxu0 %v5324_v31  ;;  %v6402_v56 = vadd.s32 40, %v988_v24  ;;  %vm1072_vm7 = vmand %vm1066_vm4, %vm1060_vm3 }
 0x3bf   : > { %4768 = vmatpush3.bf16.msra.mxu1 %v5180_v58  ;;  %4775 = vmatprep.mubr.msk.bf16.mxu1 %vm5325_vm10, %v5324_v31 }
 0x3c0   : > { %4769 = vmatprep.subr.bf16.mxu1 %v5324_v31 }
 0x3c1   : > { %4794 = vmatpush3.bf16.msra.mxu0 %v5186_v61  ;;  %v1022_v61 = vshrl.u32 %v6380_v45, 3 }
 0x3c2   : > { %4807 = vmatprep.subr.bf16.mxu0 %v5324_v31 }
 0x3c3   : > { %4770 = vmatpush3.bf16.msra.mxu1 %v5182_v62  ;;  %4756 = vmatmul.mubr.msk.bf16.gmra.mrb[76].mxu0 %vm1249_vm15, %v6269_v63  ;;  %v6414_v62 = vmul.u32.u64.low 2863311531, %v6393_v53  ;;  %v6415_v0 = vmul.u32.u64.high 2863311531, %v6393_v53, %v6414_v62 }
 0x3c4   : > { %4771 = vmatprep.subr.bf16.mxu1 %v5324_v31  ;;  %4795 = vmatprep.mubr.msk.bf16.mxu0 %vm5325_vm10, %v5324_v31 }
 0x3c5   : > { %v1044_v24 = vshrl.u32 %v6415_v0, 3 }
 0x3c7   : > { %4772 = vmatpush3.bf16.msra.mxu1 %v5185_v41 }
 0x3c8   : > { %4773 = vmatprep.subr.bf16.mxu1 %v5324_v31 }
 0x3cb   : > { %4774 = vmatpush3.bf16.msra.mxu1 %v5187_v3  ;;  %4796 = vmatmul.mubr.msk.bf16.vlgmr.msra.gmra.mrb[80].mxu0 %vm1249_vm15, %v3118_v5  ;;  %v1013_v3 = vsub.s32 %v989_v26, %v1012_v9  ;;  %v1033_v5 = vshrl.u32 %v6387_v22, 3 }
 0x3cc   : > { %4808 = vmatpush3.bf16.msra.mxu0 %v5188_v7  ;;  %4871 = vmatprep.subr.bf16.mxu1 %v5324_v31 }
 0x3cd   : > { %4809 = vmatprep.subr.bf16.mxu0 %v5324_v31  ;;  %4799 = vmatprep.mubr.msk.bf16.mxu0 %vm5325_vm10, %v5324_v31  ;;  %vm1061_vm5 = vcmp.ne.s32.totalorder %v1013_v3, 0  ;;  %vm1067_vm6 = vcmp.lt.s32.totalorder %v1013_v3, 0  ;;  %v1034_v17 = vmul.u32 12, %v1033_v5 }
 0x3ce   : > { %4776 = vmatmul.mubr.bf16.vlgmr.msra.gmra.mrb[48].mxu1 %v5772_v11  ;;  %v5191_v11 = vld [vmem:[%s6662_s7 + $0x218] sm:$0xff]   ;;  %vm1073_vm8 = vmand %vm1067_vm6, %vm1061_vm5 }
 0x3cf   : > { %4879 = vmatpush3.bf16.msra.mxu1 %v5188_v7  ;;  %4779 = vmatprep.mubr.msk.bf16.mxu1 %vm5325_vm10, %v5324_v31  ;;  %v6419_v7 = vmul.u32.u64.low 2863311531, %v6402_v56  ;;  %v6420_v13 = vmul.u32.u64.high 2863311531, %v6402_v56, %v6419_v7  ;;  %v1035_v40 = vsub.s32 %v6371_v44, %v1034_v17 }
 0x3d0   : > { %4810 = vmatpush3.bf16.msra.mxu0 %v5189_v10  ;;  %4872 = vmatprep.subr.bf16.mxu1 %v5324_v31 }
 0x3d1   : > { %4811 = vmatprep.subr.bf16.mxu0 %v5324_v31  ;;  %v1055_v50 = vshrl.u32 %v6420_v13, 3  ;;  %vm1063_vm14 = vcmp.ne.s32.totalorder %v1035_v40, 0  ;;  %vm1069_vm0 = vcmp.lt.s32.totalorder %v1035_v40, 0 }
 0x3d2   : > { %vm1075_vm3 = vmand %vm1069_vm0, %vm1063_vm14 }
 0x3d3   : > { %4880 = vmatpush3.bf16.msra.mxu1 %v5189_v10  ;;  %4800 = vmatmul.mubr.msk.bf16.gmra.mrb[84].mxu0 %vm1249_vm15, %v3123_v15  ;;  %v1078_v15 = vadd.s32 12, %v1002_v23 }
 0x3d4   : > { %4812 = vmatpush3.bf16.msra.mxu0 %v5190_v33  ;;  %4873 = vmatprep.subr.bf16.mxu1 %v5324_v31 }
 0x3d5   : > { %4813 = vmatprep.subr.bf16.mxu0 %v5324_v31  ;;  %4803 = vmatprep.mubr.msk.bf16.mxu0 %vm5325_vm10, %v5324_v31 }
 0x3d6   : > { %4780 = vmatmul.mubr.bf16.gmra.mrb[52].mxu1 %v5797_v32  ;;  %v5194_v32 = vld [vmem:[%s6662_s7 + $0x228] sm:$0xff]  }
 0x3d7   : > { %4881 = vmatpush3.bf16.msra.mxu1 %v5190_v33  ;;  %4783 = vmatprep.mubr.msk.bf16.mxu1 %vm5325_vm10, %v5324_v31  ;;  %v1023_v33 = vmul.u32 12, %v1022_v61 }
 0x3d8   : > { %4814 = vmatpush3.bf16.msra.mxu0 %v5191_v11  ;;  %4874 = vmatprep.subr.bf16.mxu1 %v5324_v31 }
 0x3d9   : > { %4815 = vmatprep.subr.bf16.mxu0 %v5324_v31 }
 0x3db   : > { %4882 = vmatpush3.bf16.msra.mxu1 %v5191_v11  ;;  %4804 = vmatmul.mubr.msk.bf16.gmra.mrb[88].mxu0 %vm1249_vm15, %v3131_v21  ;;  %v1024_v21 = vsub.s32 %v6365_v47, %v1023_v33  ;;  %v1045_v47 = vmul.u32 12, %v1044_v24 }
 0x3dc   : > { %4816 = vmatpush3.bf16.msra.mxu0 %v5192_v25  ;;  %4875 = vmatprep.subr.bf16.mxu1 %v5324_v31 }
 0x3dd   : > { %4817 = vmatprep.subr.bf16.mxu0 %v5324_v31  ;;  %4823 = vmatprep.mubr.msk.bf16.mxu0 %vm5325_vm10, %v5324_v31  ;;  %vm1062_vm9 = vcmp.ne.s32.totalorder %v1024_v21, 0  ;;  %vm1068_vm11 = vcmp.lt.s32.totalorder %v1024_v21, 0  ;;  %v1080_v38 = vadd.s32 12, %v1024_v21  ;;  %v1046_v46 = vsub.s32 %v6393_v53, %v1045_v47 }
 0x3de   : > { %4784 = vmatmul.mubr.bf16.gmra.mrb[56].mxu1 %v5815_v43  ;;  %v5196_v43 = vld [vmem:[%s6662_s7 + $0x238] sm:$0xff]   ;;  %vm1074_vm2 = vmand %vm1068_vm11, %vm1062_vm9  ;;  %v3377_v53 = vsel %vm1662_vm13, %v3374_v20, %v3376_v36 }
 0x3df   : > { %4883 = vmatpush3.bf16.msra.mxu1 %v5192_v25  ;;  %4827 = vmatprep.mubr.msk.bf16.mxu1 %vm5325_vm10, %v5324_v31  ;;  %v1079_v25 = vadd.s32 12, %v1013_v3  ;;  %vm1064_vm4 = vcmp.ne.s32.totalorder %v1046_v46, 0  ;;  %vm1070_vm5 = vcmp.lt.s32.totalorder %v1046_v46, 0  ;;  %v1082_v61 = vadd.s32 12, %v1046_v46 }
 0x3e0   : > { %4818 = vmatpush3.bf16.msra.mxu0 %v5194_v32  ;;  %4876 = vmatprep.subr.bf16.mxu1 %v5324_v31  ;;  %vm1076_vm11 = vmand %vm1070_vm5, %vm1064_vm4 }
 0x3e1   : > { %4819 = vmatprep.subr.bf16.mxu0 %v5324_v31  ;;  %v6450_v54 = vsel %vm1073_vm8, %v1079_v25, %v1013_v3 }
 0x3e2   : > { %vm1317_vm1 = vcmp.gt.s32.totalorder %v6450_v54, 0 }
 0x3e3   : > { %4884 = vmatpush3.bf16.msra.mxu1 %v5194_v32 }
 0x3e4   : > { %4820 = vmatpush3.bf16.msra.mxu0 %v5195_v2  ;;  %4877 = vmatprep.subr.bf16.mxu1 %v5324_v31 }
 0x3e5   : > { %4821 = vmatprep.subr.bf16.mxu0 %v5324_v31 }
 0x3e6   : > { %v6368_v35 = vpop.f32.mrb[20].mxu0 }
 0x3e7   : > { %4885 = vmatpush3.bf16.msra.mxu1 %v5195_v2  ;;  %v4489_v4 = vpop.f32.mrb[21].mxu0  ;;  %v6445_v2 = vsel %vm1072_vm7, %v1078_v15, %v1002_v23 }
 0x3e8   : > { %4822 = vmatpush3.bf16.msra.mxu0 %v5196_v43  ;;  %4878 = vmatprep.subr.bf16.mxu1 %v5324_v31  ;;  %v6374_v29 = vpop.f32.mrb[22].mxu0  ;;  %vm1316_vm12 = vcmp.gt.s32.totalorder %v6445_v2, 0  ;;  %v1056_v4 = vmul.u32 12, %v1055_v50 }
 0x3e9   : > { %v4490_v39 = vpop.f32.mrb[23].mxu0  ;;  %4855 = vmatprep.subr.bf16.mxu0 %v5324_v31 }
 0x3ea   : > { %v1081_v39 = vadd.s32 12, %v1035_v40  ;;  %v1057_v9 = vsub.s32 %v6402_v56, %v1056_v4 }
 0x3eb   : > { %4886 = vmatpush3.bf16.msra.mxu1 %v5196_v43  ;;  %4824 = vmatmul.mubr.bf16.vlgmr.msra.gmra.mrb[92].mxu0 %v3258_v42 }
 0x3ec   : > { %4835 = vmatprep.subr.bf16.mxu1 %v5324_v31  ;;  %4859 = vmatprep.mubr.msk.bf16.mxu0 %vm5325_vm10, %v5324_v31  ;;  %v6471_v23 = vsel %vm1075_vm3, %v1081_v39, %v1035_v40  ;;  %vm1065_vm7 = vcmp.ne.s32.totalorder %v1057_v9, 0  ;;  %vm1071_vm8 = vcmp.lt.s32.totalorder %v1057_v9, 0 }
 0x3ed   : > { %vm1319_vm9 = vcmp.gt.s32.totalorder %v6471_v23, 0  ;;  %vm1077_vm14 = vmand %vm1071_vm8, %vm1065_vm7  ;;  %vm1882_vm4 = vcmp.lt.s32.totalorder %v6471_v23, 11 }
 0x3ee   : > { %4828 = vmatmul.mubr.bf16.vlgmr.msra.gmra.mrb[60].mxu1 %v3260_v55  ;;  %v6400_v52 = vpop.f32.mrb[24].mxu0  ;;  %v6467_v55 = vsel %vm1074_vm2, %v1080_v38, %v1024_v21 }
 0x3ef   : > { %4836 = vmatpush3.bf16.msra.mxu1 %v5197_v19  ;;  %v4493_v58 = vpop.f32.mrb[25].mxu0  ;;  %4831 = vmatprep.mubr.msk.bf16.mxu1 %vm5325_vm10, %v5324_v31  ;;  %vm1318_vm6 = vcmp.gt.s32.totalorder %v6467_v55, 0  ;;  %vm1881_vm3 = vcmp.lt.s32.totalorder %v6467_v55, 11 }
 0x3f0   : > { %4837 = vmatprep.subr.bf16.mxu1 %v5324_v31  ;;  %v6410_v6 = vpop.f32.mrb[26].mxu0 }
 0x3f1   : > { %v1293_v41 = vpop.f32.mrb[0].mxu1  ;;  %v4494_v12 = vpop.f32.mrb[27].mxu0 }
 0x3f2   : > { %v4461_v1 = vpop.f32.mrb[1].mxu1  ;;  %v1334_v45 = vsel %vm1316_vm12, %v1293_v41, 0.0  ;;  %v3378_v41 = vrot.slane %v6306_v14, 1 }
 0x3f3   : > { %4838 = vmatpush3.bf16.msra.mxu1 %v5198_v59  ;;  %v6422_v10 = vpop.f32.mrb[2].mxu1  ;;  %v1083_v1 = vadd.s32 12, %v1057_v9 }
 0x3f4   : > { %4839 = vmatprep.subr.bf16.mxu1 %v5324_v31  ;;  %v4462_v18 = vpop.f32.mrb[3].mxu1  ;;  %v1335_v51 = vsel %vm1317_vm1, %v6422_v10, 0.0 }
 0x3f5   : > { %v3379_v18 = vsel %vm1662_vm13, %v3376_v36, %v3378_v41  ;;  %v6488_v33 = vsel %vm1077_vm14, %v1083_v1, %v1057_v9  ;;  %vm1879_vm13 = vcmp.lt.s32.totalorder %v6445_v2, 11 }
 0x3f6   : > { %4832 = vmatmul.mubr.bf16.gmra.mrb[64].mxu1 %v5802_v34  ;;  %v6429_v16 = vpop.f32.mrb[28].mxu0  ;;  %vm1321_vm2 = vcmp.gt.s32.totalorder %v6488_v33, 0  ;;  %vm1884_vm7 = vcmp.lt.s32.totalorder %v6488_v33, 11  ;;  %v4162_v33 = vld [vmem:[%s6665_s10] ss:$0 sm:$0xff] }
 0x3f7   : > { %4840 = vmatpush3.bf16.msra.mxu1 %v5199_v48  ;;  %v4497_v11 = vpop.f32.mrb[29].mxu0  ;;  %4843 = vmatprep.mubr.msk.bf16.mxu1 %vm5325_vm10, %v5324_v31 }
 0x3f8   : > { %4841 = vmatprep.subr.bf16.mxu1 %v5324_v31  ;;  %v6439_v34 = vpop.f32.mrb[30].mxu0 }
 0x3f9   : > { %v1301_v32 = vpop.f32.mrb[4].mxu1  ;;  %v4498_v26 = vpop.f32.mrb[31].mxu0 }
 0x3fa   : > { %v4465_v27 = vpop.f32.mrb[5].mxu1  ;;  %v1336_v12 = vsel %vm1318_vm6, %v1301_v32, 0.0 }
 0x3fb   : > { %4842 = vmatpush3.bf16.msra.mxu1 %v5200_v37  ;;  %v1304_v28 = vpop.f32.mrb[6].mxu1 }
 0x3fc   : > { %v4466_v43 = vpop.f32.mrb[7].mxu1  ;;  %v1337_v10 = vsel %vm1319_vm9, %v1304_v28, 0.0 }
 0x3fe   : > { %4844 = vmatmul.mubr.msk.bf16.vlgmr.msra.gmra.mrb[68].mxu1 %vm1249_vm15, %v3375_v60  ;;  %v1603_v44 = vpop.f32.mrb[32].mxu0 }
 0x3ff   : > { %v1604_v57 = vadd.f32 %v1603_v44, %v6368_v35  ;;  %v4509_v49 = vpop.f32.mrb[33].mxu0  ;;  %4847 = vmatprep.mubr.msk.bf16.mxu1 %vm5325_vm10, %v5324_v31 }
 0x400   : > { %v1606_v42 = vpop.f32.mrb[34].mxu0 }
 0x401   : > { %v1626_v8 = vadd.f32 %v1604_v57, %v1334_v45  ;;  %v1607_v22 = vadd.f32 %v1606_v42, %v6374_v29  ;;  %v1309_v19 = vpop.f32.mrb[8].mxu1  ;;  %v4510_v35 = vpop.f32.mrb[35].mxu0 }
 0x402   : > { %v4469_v63 = vpop.f32.mrb[9].mxu1 }
 0x403   : > { %v1627_v58 = vadd.f32 %v1607_v22, %v1335_v51  ;;  %v1312_v59 = vpop.f32.mrb[10].mxu1 }
 0x404   : > { %v4470_v29 = vpop.f32.mrb[11].mxu1  ;;  %v1339_v25 = vsel %vm1321_vm2, %v1312_v59, 0.0 }
 0x406   : > { %4848 = vmatmul.mubr.msk.bf16.gmra.mrb[60].mxu1 %vm1249_vm15, %v3377_v53  ;;  %v1611_v62 = vpop.f32.mrb[36].mxu0 }
 0x407   : > { %v1612_v56 = vadd.f32 %v1611_v62, %v6400_v52  ;;  %v4513_v0 = vpop.f32.mrb[37].mxu0  ;;  %4851 = vmatprep.mubr.msk.bf16.mxu1 %vm5325_vm10, %v5324_v31  ;;  %v6485_v52 = vsel %vm1076_vm11, %v1082_v61, %v1046_v46 }
 0x408   : > { %v1614_v3 = vpop.f32.mrb[38].mxu0  ;;  %vm1320_vm0 = vcmp.gt.s32.totalorder %v6485_v52, 0  ;;  %vm1883_vm5 = vcmp.lt.s32.totalorder %v6485_v52, 11 }
 0x409   : > { %v1628_v5 = vadd.f32 %v1612_v56, %v1336_v12  ;;  %v1615_v7 = vadd.f32 %v1614_v3, %v6410_v6  ;;  %v4514_v13 = vpop.f32.mrb[39].mxu0  ;;  %v1338_v17 = vsel %vm1320_vm0, %v1309_v19, 0.0 }
 0x40b   : > { %v1629_v48 = vadd.f32 %v1615_v7, %v1337_v10 }
 0x40e   : > { %4852 = vmatmul.mubr.msk.bf16.gmra.mrb[64].mxu1 %vm1249_vm15, %v3379_v18  ;;  %v1619_v14 = vpop.f32.mrb[40].mxu0  ;;  %vm1880_vm15 = vcmp.lt.s32.totalorder %v6450_v54, 11 }
 0x40f   : > { %v1620_v6 = vadd.f32 %v1619_v14, %v6429_v16  ;;  %v4517_v15 = vpop.f32.mrb[41].mxu0 }
 0x410   : > { %v1622_v11 = vpop.f32.mrb[42].mxu0 }
 0x411   : > { %v1630_v37 = vadd.f32 %v1620_v6, %v1338_v17  ;;  %v1623_v30 = vadd.f32 %v1622_v11, %v6439_v34  ;;  %v4518_v20 = vpop.f32.mrb[43].mxu0 }
 0x413   : > { %v1631_v21 = vadd.f32 %v1623_v30, %v1339_v25 }
 0x429   : > { %v1856_v24 = vpop.f32.mrb[12].mxu1 }
 0x42a   : > { %v1897_v16 = vsel %vm1879_vm13, %v1856_v24, 0.0  ;;  %v4557_v32 = vpop.f32.mrb[13].mxu1 }
 0x42b   : > { %v1903_v26 = vadd.f32 %v1897_v16, %v1626_v8  ;;  %v1859_v27 = vpop.f32.mrb[14].mxu1 }
 0x42c   : > { %v1898_v40 = vsel %vm1880_vm15, %v1859_v27, 0.0  ;;  %v4558_v34 = vpop.f32.mrb[15].mxu1 }
 0x42d   : > { %v1904_v50 = vadd.f32 %v1898_v40, %v1627_v58 }
 0x431   : > { %v1864_v28 = vpop.f32.mrb[16].mxu1 }
 0x432   : > { %v1899_v60 = vsel %vm1881_vm3, %v1864_v28, 0.0  ;;  %v4561_v43 = vpop.f32.mrb[17].mxu1 }
 0x433   : > { %v1905_v47 = vadd.f32 %v1899_v60, %v1628_v5  ;;  %v1867_v38 = vpop.f32.mrb[18].mxu1  ;;  %v5201_v43 = vld [vmem:[%s6664_s9] sm:$0xff]  }
 0x434   : > { %v1900_v44 = vsel %vm1882_vm4, %v1867_v38, 0.0  ;;  %v4562_v4 = vpop.f32.mrb[19].mxu1  ;;  %4856 = vmatpush3.bf16.msra.mxu0 %v5201_v43 }
 0x435   : > { %v1906_v57 = vadd.f32 %v1900_v44, %v1629_v48  ;;  %4857 = vmatprep.subr.bf16.mxu0 %v5324_v31 }
 0x436   : > { %v2141_v49 = vpop.f32.mrb[44].mxu0 }
 0x437   : > { %v2164_v36 = vsel %vm1316_vm12, %v2141_v49, 0.0  ;;  %v4605_v45 = vpop.f32.mrb[45].mxu0 }
 0x438   : > { %v2170_v39 = vadd.f32 %v2164_v36, %v1903_v26  ;;  %v2144_v42 = vpop.f32.mrb[46].mxu0 }
 0x439   : > { %v2165_v46 = vsel %vm1317_vm1, %v2144_v42, 0.0  ;;  %v1872_v8 = vpop.f32.mrb[20].mxu1  ;;  %v4606_v22 = vpop.f32.mrb[47].mxu0 }
 0x43a   : > { %v2171_v19 = vadd.f32 %v2165_v46, %v1904_v50  ;;  %v1901_v35 = vsel %vm1883_vm5, %v1872_v8, 0.0  ;;  %v4565_v51 = vpop.f32.mrb[21].mxu1 }
 0x43b   : > { %v1907_v63 = vadd.f32 %v1901_v35, %v1630_v37  ;;  %v1875_v9 = vpop.f32.mrb[22].mxu1 }
 0x43c   : > { %v1902_v58 = vsel %vm1884_vm7, %v1875_v9, 0.0  ;;  %v4566_v59 = vpop.f32.mrb[23].mxu1 }
 0x43d   : > { %v1908_v53 = vadd.f32 %v1902_v58, %v1631_v21 }
 0x43e   : > { %v2149_v29 = vpop.f32.mrb[48].mxu0 }
 0x43f   : > { %v2166_v61 = vsel %vm1318_vm6, %v2149_v29, 0.0  ;;  %v4609_v62 = vpop.f32.mrb[49].mxu0 }
 0x440   : > { %v2172_v56 = vadd.f32 %v2166_v61, %v1905_v47  ;;  %v2152_v0 = vpop.f32.mrb[50].mxu0 }
 0x441   : > { %v2167_v41 = vsel %vm1319_vm9, %v2152_v0, 0.0  ;;  %v4610_v12 = vpop.f32.mrb[51].mxu0 }
 0x442   : > { %v2173_v1 = vadd.f32 %v2167_v41, %v1906_v57 }
 0x446   : > { %v2157_v3 = vpop.f32.mrb[52].mxu0 }
 0x447   : > { %v2168_v5 = vsel %vm1320_vm0, %v2157_v3, 0.0  ;;  %v4613_v7 = vpop.f32.mrb[53].mxu0 }
 0x448   : > { %v2174_v13 = vadd.f32 %v2168_v5, %v1907_v63  ;;  %v2160_v10 = vpop.f32.mrb[54].mxu0 }
 0x449   : > { %v2169_v48 = vsel %vm1321_vm2, %v2160_v10, 0.0  ;;  %v2323_v18 = vpop.f32.mrb[24].mxu1  ;;  %v4614_v14 = vpop.f32.mrb[55].mxu0 }
 0x44a   : > { %v2175_v6 = vadd.f32 %v2169_v48, %v1908_v53  ;;  %v4633_v15 = vpop.f32.mrb[25].mxu1 }
 0x44b   : > { %v2326_v17 = vpop.f32.mrb[26].mxu1 }
 0x44c   : > { %v4634_v11 = vpop.f32.mrb[27].mxu1 }
 0x44e   : > { %v2448_v37 = vpop.f32.mrb[56].mxu0 }
 0x44f   : > { %v2449_v30 = vadd.f32 %v2448_v37, %v2323_v18  ;;  %v4653_v20 = vpop.f32.mrb[57].mxu0 }
 0x450   : > { %v2451_v25 = vpop.f32.mrb[58].mxu0 }
 0x451   : > { %v2471_v21 = vadd.f32 %v2449_v30, %v2170_v39  ;;  %v2331_v24 = vpop.f32.mrb[28].mxu1  ;;  %v2452_v16 = vadd.f32 %v2451_v25, %v2326_v17  ;;  %v4654_v32 = vpop.f32.mrb[59].mxu0  ;;  %v5202_v39 = vld [vmem:[%s6664_s9 + $0x8] sm:$0xff]  }
 0x452   : > { %v4637_v26 = vpop.f32.mrb[29].mxu1  ;;  %4858 = vmatpush3.bf16.msra.mxu0 %v5202_v39 }
 0x453   : > { %v2472_v27 = vadd.f32 %v2452_v16, %v2171_v19  ;;  %v2334_v40 = vpop.f32.mrb[30].mxu1 }
 0x454   : > { %v4638_v34 = vpop.f32.mrb[31].mxu1 }
 0x456   : > { %v2456_v50 = vpop.f32.mrb[60].mxu0 }
 0x457   : > { %v2457_v28 = vadd.f32 %v2456_v50, %v2331_v24  ;;  %v4657_v60 = vpop.f32.mrb[61].mxu0 }
 0x458   : > { %v2459_v47 = vpop.f32.mrb[62].mxu0 }
 0x459   : > { %v2473_v38 = vadd.f32 %v2457_v28, %v2172_v56  ;;  %v2339_v44 = vpop.f32.mrb[32].mxu1  ;;  %v2460_v4 = vadd.f32 %v2459_v47, %v2334_v40  ;;  %v4658_v57 = vpop.f32.mrb[63].mxu0 }
 0x45a   : > { %v4641_v49 = vpop.f32.mrb[33].mxu1 }
 0x45b   : > { %v2474_v36 = vadd.f32 %v2460_v4, %v2173_v1  ;;  %v2342_v45 = vpop.f32.mrb[34].mxu1 }
 0x45c   : > { %v4642_v42 = vpop.f32.mrb[35].mxu1 }
 0x45e   : > { %v2464_v46 = vpop.f32.mrb[64].mxu0 }
 0x45f   : > { %v2465_v8 = vadd.f32 %v2464_v46, %v2339_v44  ;;  %v4661_v22 = vpop.f32.mrb[65].mxu0 }
 0x460   : > { %v2467_v19 = vpop.f32.mrb[66].mxu0 }
 0x461   : > { %v2475_v35 = vadd.f32 %v2465_v8, %v2174_v13  ;;  %v2468_v51 = vadd.f32 %v2467_v19, %v2342_v45  ;;  %v4662_v63 = vpop.f32.mrb[67].mxu0 }
 0x463   : > { %v2476_v9 = vadd.f32 %v2468_v51, %v2175_v6 }
 0x481   : > { %v2693_v58 = vpop.f32.mrb[36].mxu1 }
 0x482   : > { %v2716_v59 = vsel %vm1879_vm13, %v2693_v58, 0.0  ;;  %v4701_v53 = vpop.f32.mrb[37].mxu1 }
 0x483   : > { %v2722_v29 = vadd.f32 %v2716_v59, %v2471_v21  ;;  %v2696_v61 = vpop.f32.mrb[38].mxu1 }
 0x484   : > { %v2717_v62 = vsel %vm1880_vm15, %v2696_v61, 0.0  ;;  %v4702_v56 = vpop.f32.mrb[39].mxu1 }
 0x485   : > { %v2723_v0 = vadd.f32 %v2717_v62, %v2472_v27 }
 0x486   : > { %v2926_v41 = vpop.f32.mrb[68].mxu0 }
 0x487   : > { %v2949_v12 = vsel %vm1316_vm12, %v2926_v41, 0.0  ;;  %v4749_v1 = vpop.f32.mrb[69].mxu0 }
 0x488   : > { %v2955_v3 = vadd.f32 %v2949_v12, %v2722_v29  ;;  %v2929_v5 = vpop.f32.mrb[70].mxu0 }
 0x489   : > { %v2950_v7 = vsel %vm1317_vm1, %v2929_v5, 0.0  ;;  %v2701_v13 = vpop.f32.mrb[40].mxu1  ;;  %v4750_v10 = vpop.f32.mrb[71].mxu0 }
 0x48a   : > { %v2956_v48 = vadd.f32 %v2950_v7, %v2723_v0  ;;  %v2718_v18 = vsel %vm1881_vm3, %v2701_v13, 0.0  ;;  %v4705_v14 = vpop.f32.mrb[41].mxu1 }
 0x48b   : > { %v2724_v6 = vadd.f32 %v2718_v18, %v2473_v38  ;;  %v2704_v15 = vpop.f32.mrb[42].mxu1 }
 0x48c   : > { %v2719_v17 = vsel %vm1882_vm4, %v2704_v15, 0.0  ;;  %v4706_v11 = vpop.f32.mrb[43].mxu1 }
 0x48d   : > { %v2725_v37 = vadd.f32 %v2719_v17, %v2474_v36 }
 0x48e   : > { %v2934_v30 = vpop.f32.mrb[72].mxu0 }
 0x48f   : > { %v2951_v20 = vsel %vm1318_vm6, %v2934_v30, 0.0  ;;  %v4753_v25 = vpop.f32.mrb[73].mxu0  ;;  %vm3539_vm6 = vcmask 261120  }
 0x490   : > { %v2957_v21 = vadd.f32 %v2951_v20, %v2724_v6  ;;  %v2937_v24 = vpop.f32.mrb[74].mxu0 }
 0x491   : > { %v2952_v16 = vsel %vm1319_vm9, %v2937_v24, 0.0  ;;  %v2709_v32 = vpop.f32.mrb[44].mxu1  ;;  %v4754_v26 = vpop.f32.mrb[75].mxu0 }
 0x492   : > { %v2958_v27 = vadd.f32 %v2952_v16, %v2725_v37  ;;  %v2720_v40 = vsel %vm1883_vm5, %v2709_v32, 0.0  ;;  %v4709_v34 = vpop.f32.mrb[45].mxu1 }
 0x493   : > { %v2726_v50 = vadd.f32 %v2720_v40, %v2475_v35  ;;  %v2712_v28 = vpop.f32.mrb[46].mxu1 }
 0x494   : > { %v2721_v60 = vsel %vm1884_vm7, %v2712_v28, 0.0  ;;  %v4710_v43 = vpop.f32.mrb[47].mxu1  ;;  %v4161_v28 = vld [vmem:[%s6663_s8] ss:$0 sm:$0xff] }
 0x495   : > { %v2727_v47 = vadd.f32 %v2721_v60, %v2476_v9 }
 0x496   : > { %v2942_v38 = vpop.f32.mrb[76].mxu0 }
 0x497   : > { %v2953_v44 = vsel %vm1320_vm0, %v2942_v38, 0.0  ;;  %v4757_v4 = vpop.f32.mrb[77].mxu0 }
 0x498   : > { %v2959_v57 = vadd.f32 %v2953_v44, %v2726_v50  ;;  %v2945_v49 = vpop.f32.mrb[78].mxu0 }
 0x499   : > { %v2954_v36 = vsel %vm1321_vm2, %v2945_v49, 0.0  ;;  %v4758_v45 = vpop.f32.mrb[79].mxu0 }
 0x49a   : > { %v2960_v39 = vadd.f32 %v2954_v36, %v2727_v47 }
 0x49e   : > { %v3199_v42 = vpop.f32.mrb[80].mxu0 }
 0x49f   : > { %v4797_v46 = vpop.f32.mrb[81].mxu0 }
 0x4a0   : > { %v3202_v8 = vpop.f32.mrb[82].mxu0 }
 0x4a1   : > { %v3092_v22 = vpop.f32.mrb[48].mxu1  ;;  %v4798_v19 = vpop.f32.mrb[83].mxu0 }
 0x4a2   : > { %v3200_v35 = vadd.f32 %v3199_v42, %v3092_v22  ;;  %v4777_v51 = vpop.f32.mrb[49].mxu1 }
 0x4a3   : > { %v3095_v63 = vpop.f32.mrb[50].mxu1 }
 0x4a4   : > { %v3222_v9 = vadd.f32 %v3200_v35, %v2955_v3  ;;  %v3203_v58 = vadd.f32 %v3202_v8, %v3095_v63  ;;  %v4778_v59 = vpop.f32.mrb[51].mxu1 }
 0x4a6   : > { %v3223_v53 = vadd.f32 %v3203_v58, %v2956_v48  ;;  %v3207_v29 = vpop.f32.mrb[84].mxu0 }
 0x4a7   : > { %v4801_v61 = vpop.f32.mrb[85].mxu0 }
 0x4a8   : > { %v3210_v62 = vpop.f32.mrb[86].mxu0 }
 0x4a9   : > { %v3100_v56 = vpop.f32.mrb[52].mxu1  ;;  %v4802_v0 = vpop.f32.mrb[87].mxu0 }
 0x4aa   : > { %v3208_v41 = vadd.f32 %v3207_v29, %v3100_v56  ;;  %v4781_v12 = vpop.f32.mrb[53].mxu1 }
 0x4ab   : > { %v3103_v1 = vpop.f32.mrb[54].mxu1 }
 0x4ac   : > { %v3224_v5 = vadd.f32 %v3208_v41, %v2957_v21  ;;  %v3211_v7 = vadd.f32 %v3210_v62, %v3103_v1  ;;  %v4782_v13 = vpop.f32.mrb[55].mxu1 }
 0x4ae   : > { %v3225_v10 = vadd.f32 %v3211_v7, %v2958_v27  ;;  %v3215_v18 = vpop.f32.mrb[88].mxu0 }
 0x4af   : > { %v4805_v14 = vpop.f32.mrb[89].mxu0 }
 0x4b0   : > { %v3218_v6 = vpop.f32.mrb[90].mxu0 }
 0x4b1   : > { %v3108_v15 = vpop.f32.mrb[56].mxu1  ;;  %v4806_v3 = vpop.f32.mrb[91].mxu0 }
 0x4b2   : > { %v3216_v17 = vadd.f32 %v3215_v18, %v3108_v15  ;;  %v4785_v11 = vpop.f32.mrb[57].mxu1 }
 0x4b3   : > { %v3111_v48 = vpop.f32.mrb[58].mxu1 }
 0x4b4   : > { %v3226_v37 = vadd.f32 %v3216_v17, %v2959_v57  ;;  %v3219_v30 = vadd.f32 %v3218_v6, %v3111_v48  ;;  %v4786_v20 = vpop.f32.mrb[59].mxu1 }
 0x4b6   : > { %v3227_v25 = vadd.f32 %v3219_v30, %v2960_v39 }
 0x4be   : > { %v3348_v24 = vpop.f32.mrb[92].mxu0 }
 0x4bf   : > { %v4825_v16 = vpop.f32.mrb[93].mxu0 }
 0x4c0   : > { %v3351_v32 = vpop.f32.mrb[94].mxu0 }
 0x4c1   : > { %v4826_v26 = vpop.f32.mrb[95].mxu0 }
 0x4d1   : > { %v3447_v21 = vpop.f32.mrb[68].mxu1 }
 0x4d2   : > { %v3448_v40 = vadd.f32 %v3447_v21, %v3348_v24  ;;  %v4845_v34 = vpop.f32.mrb[69].mxu1 }
 0x4d3   : > { %v3450_v27 = vpop.f32.mrb[70].mxu1 }
 0x4d4   : > { %v3470_v50 = vsel %vm1879_vm13, %v3448_v40, 0.0  ;;  %v3451_v60 = vadd.f32 %v3450_v27, %v3351_v32  ;;  %v4846_v43 = vpop.f32.mrb[71].mxu1 }
 0x4d5   : > { %v3476_v47 = vadd.f32 %v3470_v50, %v3222_v9 }
 0x4d6   : > { %v3471_v38 = vsel %vm1880_vm15, %v3451_v60, 0.0 }
 0x4d7   : > { %v3489_v44 = vadd.f32 %v4161_v28, %v3476_v47  ;;  %v3477_v4 = vadd.f32 %v3471_v38, %v3223_v53 }
 0x4d9   : > { %v3501_v57 = vmul.f32 0.2, %v3489_v44  ;;  %v3490_v49 = vadd.f32 %v4161_v28, %v3477_v4  ;;  %v3455_v36 = vpop.f32.mrb[60].mxu1  ;;  %vm3495_vm12 = vcmp.ge.f32.partialorder %v3489_v44, 0.0 }
 0x4da   : > { %v3472_v2 = vsel %vm1881_vm3, %v3455_v36, 0.0  ;;  %v4849_v45 = vpop.f32.mrb[61].mxu1 }
 0x4db   : > { %vm3496_vm1 = vcmp.ge.f32.partialorder %v3490_v49, 0.0  ;;  %v3502_v39 = vmul.f32 0.2, %v3490_v49  ;;  %v3478_v42 = vadd.f32 %v3472_v2, %v3224_v5  ;;  %v3458_v46 = vpop.f32.mrb[62].mxu1  ;;  %v3507_v54 = vsel %vm3495_vm12, %v3489_v44, %v3501_v57 }
 0x4dc   : > { %v3473_v8 = vsel %vm1882_vm4, %v3458_v46, 0.0  ;;  %v4850_v22 = vpop.f32.mrb[63].mxu1 }
 0x4dd   : > { %v3508_v19 = vsel %vm3496_vm1, %v3490_v49, %v3502_v39  ;;  %v3491_v35 = vadd.f32 %v4161_v28, %v3478_v42  ;;  %v3479_v51 = vadd.f32 %v3473_v8, %v3225_v10 }
 0x4de   : > { %v3513_v63 = vpack.c.bf16 %v3508_v19, %v3507_v54 }
 0x4df   : > { %v3503_v9 = vmul.f32 0.2, %v3491_v35  ;;  %v3492_v58 = vadd.f32 %v4161_v28, %v3479_v51  ;;  %vm3497_vm8 = vcmp.ge.f32.partialorder %v3491_v35, 0.0 }
 0x4e0   : > { %4860 = vmatmul.mubr.msk.bf16.vlgmr.msra.gmra.mrb[96].mxu0 %vm3539_vm6, %v3513_v63 }
 0x4e1   : > { %vm3498_vm9 = vcmp.ge.f32.partialorder %v3492_v58, 0.0  ;;  %v3504_v55 = vmul.f32 0.2, %v3492_v58  ;;  %v3463_v59 = vpop.f32.mrb[64].mxu1  ;;  %4863 = vmatprep.mubr.msk.bf16.mxu0 %vm5325_vm10, %v5324_v31  ;;  %v3509_v29 = vsel %vm3497_vm8, %v3491_v35, %v3503_v9 }
 0x4e2   : > { %v3474_v23 = vsel %vm1883_vm5, %v3463_v59, 0.0  ;;  %v4853_v53 = vpop.f32.mrb[65].mxu1 }
 0x4e3   : > { %v3510_v61 = vsel %vm3498_vm9, %v3492_v58, %v3504_v55  ;;  %v3480_v62 = vadd.f32 %v3474_v23, %v3226_v37  ;;  %v3466_v56 = vpop.f32.mrb[66].mxu1 }
 0x4e4   : > { %v3475_v0 = vsel %vm1884_vm7, %v3466_v56, 0.0  ;;  %v4854_v41 = vpop.f32.mrb[67].mxu1  ;;  %v3514_v12 = vpack.c.bf16 %v3510_v61, %v3509_v29 }
 0x4e5   : > { %v3493_v1 = vadd.f32 %v4161_v28, %v3480_v62  ;;  %v3481_v5 = vadd.f32 %v3475_v0, %v3227_v25 }
 0x4e7   : > { %v3505_v7 = vmul.f32 0.2, %v3493_v1  ;;  %v3494_v13 = vadd.f32 %v4161_v28, %v3481_v5  ;;  %vm3499_vm11 = vcmp.ge.f32.partialorder %v3493_v1, 0.0 }
 0x4e8   : > { %4864 = vmatmul.mubr.msk.bf16.gmra.mrb[100].mxu0 %vm3539_vm6, %v3514_v12 }
 0x4e9   : > { %vm3500_vm14 = vcmp.ge.f32.partialorder %v3494_v13, 0.0  ;;  %v3506_v52 = vmul.f32 0.2, %v3494_v13  ;;  %4867 = vmatprep.mubr.msk.bf16.mxu0 %vm5325_vm10, %v5324_v31  ;;  %v3511_v10 = vsel %vm3499_vm11, %v3493_v1, %v3505_v7 }
 0x4eb   : > { %v3512_v18 = vsel %vm3500_vm14, %v3494_v13, %v3506_v52 }
 0x4ec   : > { %v3515_v14 = vpack.c.bf16 %v3512_v18, %v3511_v10 }
 0x4f0   : > { %4868 = vmatmul.mubr.msk.bf16.gmra.mrb[104].mxu0 %vm3539_vm6, %v3515_v14 }
 0x5b3   : > { %v3583_v6 = vpop.f32.mrb[96].mxu0 }
 0x5b4   : > { %v3584_v15 = vadd.f32 %v4162_v33, %v3583_v6  ;;  %v4861_v3 = vpop.f32.mrb[97].mxu0 }
 0x5b5   : > { %v3586_v17 = vpop.f32.mrb[98].mxu0 }
 0x5b6   : > { %3606 = vmax.xlane.f32.xlu0 %v3584_v15  ;;  %v4862_v11 = vpop.f32.mrb[99].mxu0  ;;  %v3587_v48 = vadd.f32 %v4162_v33, %v3586_v17 }
 0x5ba   : > { %3608 = vmax.xlane.f32.xlu0 %v3587_v48 }
 0x5bb   : > { %v3591_v37 = vpop.f32.mrb[100].mxu0 }
 0x5bc   : > { %v3592_v30 = vadd.f32 %v4162_v33, %v3591_v37  ;;  %v4865_v31 = vpop.f32.mrb[101].mxu0 }
 0x5bd   : > { %v3594_v20 = vpop.f32.mrb[102].mxu0 }
 0x5be   : > { %3610 = vmax.xlane.f32.xlu1 %v3592_v30  ;;  %v4866_v25 = vpop.f32.mrb[103].mxu0  ;;  %v3595_v24 = vadd.f32 %v4162_v33, %v3594_v20 }
 0x5c2   : > { %3612 = vmax.xlane.f32.xlu1 %v3595_v24 }
 0x5c3   : > { %v3599_v16 = vpop.f32.mrb[104].mxu0 }
 0x5c4   : > { %v3600_v32 = vadd.f32 %v4162_v33, %v3599_v16  ;;  %v4869_v26 = vpop.f32.mrb[105].mxu0 }
 0x5c5   : > { %v3602_v21 = vpop.f32.mrb[106].mxu0 }
 0x5c6   : > { %v3603_v40 = vadd.f32 %v4162_v33, %v3602_v21  ;;  %3614 = vmax.xlane.f32.xlu0 %v3600_v32  ;;  %v4870_v34 = vpop.f32.mrb[107].mxu0 }
 0x5c8   : > { %3616 = vmax.xlane.f32.xlu1 %v3603_v40 }
 0x643   : > { %v3607_v27 = vpop.xlane.xlu0 %3606 }
 0x644   : > { %v3618_v50 = vsub.f32 %v3584_v15, %v3607_v27 }
 0x646   : > { %v3624_v28 = vmul.f32 1.442695, %v3618_v50 }
 0x647   : > { %v3609_v60 = vpop.xlane.xlu0 %3608 }
 0x648   : > { %5203 = vpow2.f32 %v3624_v28  ;;  %v3619_v43 = vsub.f32 %v3587_v48, %v3609_v60 }
 0x64a   : > { %v3626_v47 = vmul.f32 1.442695, %v3619_v43 }
 0x64b   : > { %v3611_v38 = vpop.xlane.xlu1 %3610 }
 0x64c   : > { %5205 = vpow2.f32 %v3626_v47  ;;  %v3620_v44 = vsub.f32 %v3592_v30, %v3611_v38 }
 0x64e   : > { %v3628_v4 = vmul.f32 1.442695, %v3620_v44 }
 0x64f   : > { %v3613_v57 = vpop.xlane.xlu1 %3612 }
 0x650   : > { %5207 = vpow2.f32 %v3628_v4  ;;  %v3621_v49 = vsub.f32 %v3595_v24, %v3613_v57 }
 0x652   : > { %v5204_v36 = vpop.eup %5203  ;;  %v3630_v2 = vmul.f32 1.442695, %v3621_v49 }
 0x653   : > { %3636 = vadd.xlane.f32.xlu0 %v5204_v36  ;;  %v3615_v45 = vpop.xlane.xlu0 %3614 }
 0x654   : > { %5209 = vpow2.f32 %v3630_v2  ;;  %v3622_v39 = vsub.f32 %v3600_v32, %v3615_v45 }
 0x655   : > { %v3617_v42 = vpop.xlane.xlu1 %3616 }
 0x656   : > { %v5206_v46 = vpop.eup %5205  ;;  %v3632_v8 = vmul.f32 1.442695, %v3622_v39  ;;  %v3623_v22 = vsub.f32 %v3603_v40, %v3617_v42 }
 0x657   : > { %3638 = vadd.xlane.f32.xlu1 %v5206_v46 }
 0x658   : > { %5211 = vpow2.f32 %v3632_v8  ;;  %v3634_v54 = vmul.f32 1.442695, %v3623_v22 }
 0x65a   : > { %v5208_v19 = vpop.eup %5207  ;;  %5213 = vpow2.f32 %v3634_v54 }
 0x65b   : > { %3640 = vadd.xlane.f32.xlu0 %v5208_v19 }
 0x65e   : > { %v5210_v35 = vpop.eup %5209 }
 0x65f   : > { %3642 = vadd.xlane.f32.xlu1 %v5210_v35 }
 0x662   : > { %v5212_v51 = vpop.eup %5211 }
 0x663   : > { %3644 = vadd.xlane.f32.xlu0 %v5212_v51 }
 0x664   : > { %v5214_v63 = vpop.eup %5213 }
 0x665   : > { %3646 = vadd.xlane.f32.xlu1 %v5214_v63 }
 0x6e0   : > { %v3637_v9 = vpop.xlane.xlu0 %3636 }
 0x6e1   : > { %5215 = vrcp.f32 %v3637_v9 }
 0x6e4   : > { %v3639_v58 = vpop.xlane.xlu1 %3638 }
 0x6e5   : > { %5217 = vrcp.f32 %v3639_v58 }
 0x6e8   : > { %v3641_v55 = vpop.xlane.xlu0 %3640 }
 0x6e9   : > { %5219 = vrcp.f32 %v3641_v55 }
 0x6eb   : > { %v5216_v59 = vpop.eup %5215 }
 0x6ec   : > { %v3654_v23 = vmul.f32 %v5216_v59, %v5204_v36  ;;  %v3643_v53 = vpop.xlane.xlu1 %3642 }
 0x6ed   : > { %5221 = vrcp.f32 %v3643_v53 }
 0x6ee   : > { %3660 = vst [vmem:[%s5470_s29] sm:$0xff] %v3654_v23 }
 0x6ef   : > { %v5218_v29 = vpop.eup %5217 }
 0x6f0   : > { %v3655_v61 = vmul.f32 %v5218_v29, %v5206_v46  ;;  %v3645_v62 = vpop.xlane.xlu0 %3644 }
 0x6f1   : > { %5223 = vrcp.f32 %v3645_v62 }
 0x6f2   : > { %3661 = vst [vmem:[%s5470_s29 + $0x8] sm:$0xff] %v3655_v61  ;;  %v3647_v56 = vpop.xlane.xlu1 %3646 }
 0x6f3   : > { %v5220_v0 = vpop.eup %5219  ;;  %5225 = vrcp.f32 %v3647_v56 }
 0x6f4   : > { %v3656_v41 = vmul.f32 %v5220_v0, %v5208_v19 }
 0x6f6   : > { %3662 = vst [vmem:[%s5470_s29 + $0x10] sm:$0xff] %v3656_v41 }
 0x6f7   : > { %v5222_v12 = vpop.eup %5221 }
 0x6f8   : > { %v3657_v1 = vmul.f32 %v5222_v12, %v5210_v35 }
 0x6fa   : > { %3663 = vst [vmem:[%s5470_s29 + $0x18] sm:$0xff] %v3657_v1 }
 0x6fb   : > { %v5224_v5 = vpop.eup %5223 }
 0x6fc   : > { %v3658_v7 = vmul.f32 %v5224_v5, %v5212_v51 }
 0x6fd   : > { %v5226_v13 = vpop.eup %5225 }
 0x6fe   : > { %3664 = vst [vmem:[%s5470_s29 + $0x20] sm:$0xff] %v3658_v7  ;;  %v3659_v52 = vmul.f32 %v5226_v13, %v5214_v63 }
 0x700   : > { %3665 = vst [vmem:[%s5470_s29 + $0x28] sm:$0xff] %v3659_v52 }
 0x701   : > { %5240 = shalt.err (!%p5237_p7)
}
 0x702   : > { %s5241_s29 = scalar_lea.hbm %s6595_s12, 768  ;;  %s5245_s26 = scalar_lea.hbm %s6666_s11, 4608 }
 0x703   : > { %p5242_p9 = scmp.ne.s32.totalorder %s6595_s12, %s5241_s29  ;;  %p5246_p12 = scmp.lt.u32.totalorder %s6595_s12, %s6666_s11 }
 0x704   : > { %p5247_p13 = scmp.lt.u32.totalorder %s5245_s26, %s5241_s29  ;;  %p5249_p1 = scmp.lt.u32.totalorder %s5241_s29, %s6595_s12 }
 0x705   : > { %p5243_p10 = pnand %p5242_p9, %p5440_p3 }
 0x706   : > { %p5248_p0 = por %p5247_p13, %p5246_p12 }
 0x707   : > { %p5244_p11 = pneg %p5243_p10 }
 0x708   : > { %p5250_p2 = por %p5249_p1, %p5248_p0 }
 0x70a   : > { %p5251_p4 = pnand %p5250_p2, %p5244_p11 }
 0x70c   : > { %5254 = shalt.err (!%p5251_p4)
}
 0x70d   : > { %s5327_s21 = smov 128   ;;  %s5328_s28 = smov 8  }
 0x70e   : > { %4972 = dma.vmem_to_hbm [thread:$0]  (%p5440_p3), %s6597_s15, 768, %s6595_s12, %s6603_s27, %s5327_s21, %s5327_s21, %s5328_s28  }
 0x70f PF: > { %s6685_s22 = sld [smem:[#allocation6_spill]]  ;;  %p4978_p5 = scmp.ge.s32.totalorder %s5321_s24, 2 }
 0x711   : > { %p4975_p6 = pnand %p4978_p5, %p5449_p8 }
 0x715   : > { %s3697_s0 = sand.u32 1, %s6685_s22  }
 0x716   : > { %s3698_s29 = scalar_lea.sflag [#allocation4], %s3697_s0 }
 0x717   : > { %5288 = dma.done.wait (!%p4975_p6), %s3698_s29, 768  }
 0x718   : > { %5290 = vsyncadd (!%p4975_p6), %s3698_s29, 4294966528  ;;  %s24_s24 = sadd.s32 1, %s5321_s24   ;;  %s6687_s20 = sld [smem:[#allocation7_spill]] }
 0x719   : > { %p21_p7 = scmp.ge.s32.totalorder %s24_s24, 8   ;;  %s6688_s22 = sld [smem:[#allocation8_spill]] }
 0x71a   : > { %s6689_s30 = sld [smem:[#allocation9_spill]]  ;;  %s6690_s17 = smov %s5297_s18 }
 0x71b   : > { %s6691_s18 = smov %s5301_s19  ;;  %s6692_s19 = smov %s5458_s16 }
 0x71c   : > { %s6693_s21 = smov %s5317_s23  ;;  %23 = sbr.rel (!%p21_p7) target bundleno = 7 (0x7), region = 121 }
 0x720   : > { %s6694_s23 = smov %s6689_s30 }
 0x723   :  { %3703 = vsyncpa [#allocation4], 1 }
 0x724   :  { %3705 = vsyncpa [#allocation4 + $0x1], 1 }

</bundles_post_ra>
